<compile_context>
chip_gen: v6e
topology: v6e:2x2x1
jax: 0.10.0
libtpu: 0.0.40
codegen_flags: <defaults>
</compile_context>

<pallas_src>
import functools

import jax
import jax.numpy as jnp
from jax.experimental import pallas as pl
from jax.experimental.pallas import tpu as pltpu

_VMEM_LIMIT = 32 * 1024 * 1024   # explicit scoped-VMEM budget (safe on v5e/v6e/v7x)
_TM_DEFAULT = 1024               # row tile for the conv matmuls


def _round_up(x: int, m: int) -> int:
    return (x + m - 1) // m * m


# ---------------------------------------------------------------------------
# Pallas kernel: fused (M,K)@(K,N) + bias + optional leaky_relu
# ---------------------------------------------------------------------------
def _matmul_bias_act_kernel(x_ref, w_ref, b_ref, o_ref, *, leaky: bool, slope: float):
    acc = jnp.dot(x_ref[...], w_ref[...], preferred_element_type=jnp.float32)
    acc = acc + b_ref[...]                          # (TM, N) + (1, N)
    if leaky:
        acc = jnp.where(acc > 0, acc, slope * acc)
    o_ref[...] = acc.astype(o_ref.dtype)


def fused_matmul_bias_act(x, w, b, *, out_dtype, leaky=True, slope=0.01,
                          tm=_TM_DEFAULT):
    """y = act(x @ w + b)  with x:(M,K) bf16, w:(K,N) bf16, b:(1,N) f32.

    Only M is tiled by the grid; K and N stay at full extent (the weight tile
    is small and stays resident in VMEM across grid steps), so the big
    activation matrix is never padded or copied.
    """
    M, K = x.shape
    K2, N = w.shape
    assert K == K2 and b.shape == (1, N)
    tm = min(tm, M)                                 # tm==M (full dim) for small M
    grid = (pl.cdiv(M, tm),)
    return pl.pallas_call(
        functools.partial(_matmul_bias_act_kernel, leaky=leaky, slope=slope),
        out_shape=jax.ShapeDtypeStruct((M, N), out_dtype),
        grid=grid,
        in_specs=[
            pl.BlockSpec((tm, K), lambda i: (i, 0)),   # pipelined row tile
            pl.BlockSpec((K, N), lambda i: (0, 0)),    # resident weight
            pl.BlockSpec((1, N), lambda i: (0, 0)),    # resident bias
        ],
        out_specs=pl.BlockSpec((tm, N), lambda i: (i, 0)),
        compiler_params=pltpu.CompilerParams(
            dimension_semantics=("parallel",),         # v7x: shard row tiles on 2 TCs
            vmem_limit_bytes=_VMEM_LIMIT,
        ),
    )(x, w, b)


# ---------------------------------------------------------------------------
# Conv2d 3x3 (stride 2) as NHWC im2col + tiled Pallas matmul
# ---------------------------------------------------------------------------
def conv2d_leaky(x_nhwc, wmat, bias, *, stride: int, pad: int, slope=0.01,
                 tm=_TM_DEFAULT):
    """x_nhwc: (N, H, W, Cin) bf16; wmat: (9*Cin, Cout) bf16; bias: (1, Cout) f32."""
    n, _, _, cin = x_nhwc.shape
    cout = wmat.shape[1]
    k = 3
    if pad:
        x_nhwc = jnp.pad(x_nhwc, ((0, 0), (pad, pad), (pad, pad), (0, 0)))
    hp, wp = x_nhwc.shape[1], x_nhwc.shape[2]
    oh = (hp - k) // stride + 1
    ow = (wp - k) // stride + 1

    # im2col in NHWC: channels (and the next layer's lanes) stay minor; the
    # final reshape to 2D is a free (bitcast) reshape.
    taps = [x_nhwc[:, ki:ki + stride * (oh - 1) + 1:stride,
                   kj:kj + stride * (ow - 1) + 1:stride, :]
            for ki in range(k) for kj in range(k)]            # each (N, OH, OW, Cin)
    cols = jnp.concatenate(taps, axis=-1).astype(jnp.bfloat16)  # (N, OH, OW, 9*Cin)
    cols2d = cols.reshape(n * oh * ow, k * k * cin)

    out2d = fused_matmul_bias_act(cols2d, wmat, bias, out_dtype=jnp.bfloat16,
                                  leaky=True, slope=slope, tm=tm)
    return out2d.reshape(n, oh, ow, cout)                      # NHWC, free reshape


# ---------------------------------------------------------------------------
# Fused FC head: (feat | cond) -> fc1 -> leaky -> fc2 -> leaky -> fc3
# ---------------------------------------------------------------------------
def _fc_head_kernel(feat_ref, cond_ref, wa_ref, wc_ref, b1_ref,
                    w2_ref, b2_ref, w3_ref, b3_ref, o_ref, *, slope: float):
    h1 = jnp.dot(feat_ref[...], wa_ref[...], preferred_element_type=jnp.float32)
    h1 = h1 + jnp.dot(cond_ref[...], wc_ref[...], preferred_element_type=jnp.float32)
    h1 = h1 + b1_ref[...]
    h1 = jnp.where(h1 > 0, h1, slope * h1)
    h2 = jnp.dot(h1.astype(jnp.bfloat16), w2_ref[...],
                 preferred_element_type=jnp.float32) + b2_ref[...]
    h2 = jnp.where(h2 > 0, h2, slope * h2)
    # fc3 (32 -> 1) as multiply + lane reduction (avoids a degenerate N=1 matmul)
    o = jnp.sum(h2 * w3_ref[...], axis=1, keepdims=True) + b3_ref[...]
    o_ref[...] = o


def fc_head(feat, cond, w, *, slope=0.01, tm=_TM_DEFAULT):
    n, fdim = feat.shape
    cdim = cond.shape[1]
    tb = min(tm, n)
    grid = (pl.cdiv(n, tb),)
    row = lambda i: (i, 0)
    fixed = lambda i: (0, 0)
    return pl.pallas_call(
        functools.partial(_fc_head_kernel, slope=slope),
        out_shape=jax.ShapeDtypeStruct((n, 1), jnp.float32),
        grid=grid,
        in_specs=[
            pl.BlockSpec((tb, fdim), row),
            pl.BlockSpec((tb, cdim), row),
            pl.BlockSpec(w["fc1_wa"].shape, fixed),
            pl.BlockSpec(w["fc1_wc"].shape, fixed),
            pl.BlockSpec(w["fc1_b"].shape, fixed),
            pl.BlockSpec(w["fc2_w"].shape, fixed),
            pl.BlockSpec(w["fc2_b"].shape, fixed),
            pl.BlockSpec(w["fc3_w"].shape, fixed),
            pl.BlockSpec(w["fc3_b"].shape, fixed),
        ],
        out_specs=pl.BlockSpec((tb, 1), row),
        compiler_params=pltpu.CompilerParams(
            dimension_semantics=("parallel",),
            vmem_limit_bytes=_VMEM_LIMIT,
        ),
    )(feat, cond, w["fc1_wa"], w["fc1_wc"], w["fc1_b"],
      w["fc2_w"], w["fc2_b"], w["fc3_w"], w["fc3_b"])


# ---------------------------------------------------------------------------
# Parameter init (PyTorch layout) and one-time preparation for the kernels
# ---------------------------------------------------------------------------
def _uniform(key, shape, fan_in):
    bound = 1.0 / jnp.sqrt(float(fan_in))
    return jax.random.uniform(key, shape, jnp.float32, -bound, bound)


def init_params(key, add_points_norms_and_angles=True):
    cond = 7 if add_points_norms_and_angles else 5
    ks = jax.random.split(key, 14)
    p = {}
    p["conv1_w"] = _uniform(ks[0], (32, 1, 3, 3), 1 * 9)
    p["conv1_b"] = _uniform(ks[1], (32,), 1 * 9)
    p["conv2_w"] = _uniform(ks[2], (64, 32, 3, 3), 32 * 9)
    p["conv2_b"] = _uniform(ks[3], (64,), 32 * 9)
    p["conv3_w"] = _uniform(ks[4], (128, 64, 3, 3), 64 * 9)
    p["conv3_b"] = _uniform(ks[5], (128,), 64 * 9)
    p["conv4_w"] = _uniform(ks[6], (256, 128, 3, 3), 128 * 9)
    p["conv4_b"] = _uniform(ks[7], (256,), 128 * 9)
    p["fc1_w"] = _uniform(ks[8], (64, 256 + cond), 256 + cond)   # PyTorch (out, in)
    p["fc1_b"] = _uniform(ks[9], (64,), 256 + cond)
    p["fc2_w"] = _uniform(ks[10], (32, 64), 64)
    p["fc2_b"] = _uniform(ks[11], (32,), 64)
    p["fc3_w"] = _uniform(ks[12], (1, 32), 32)
    p["fc3_b"] = _uniform(ks[13], (1,), 32)
    return p


def prepare_params(p):
    """One-time weight relayout/cast (kept out of the per-forward path)."""
    w = {}
    for i in range(1, 5):
        cw = p[f"conv{i}_w"]                              # (Cout, Cin, 3, 3)
        cout, cin, kh, kw = cw.shape
        # Row order (ki*3 + kj)*Cin + c matches the im2col concat order.
        w[f"conv{i}_w"] = (jnp.transpose(cw, (2, 3, 1, 0))
                           .reshape(kh * kw * cin, cout).astype(jnp.bfloat16))
        w[f"conv{i}_b"] = p[f"conv{i}_b"].reshape(1, cout).astype(jnp.float32)
    fc1_wT = p["fc1_w"].T.astype(jnp.float32)             # (256 + cond_dim, 64)
    feat_dim = 256
    cond_dim = fc1_wT.shape[0] - feat_dim
    cpad = _round_up(cond_dim, 8)
    w["fc1_wa"] = fc1_wT[:feat_dim].astype(jnp.bfloat16)                  # (256, 64)
    w["fc1_wc"] = (jnp.zeros((cpad, fc1_wT.shape[1]), jnp.bfloat16)
                   .at[:cond_dim].set(fc1_wT[feat_dim:].astype(jnp.bfloat16)))
    w["fc1_b"] = p["fc1_b"].reshape(1, -1).astype(jnp.float32)
    w["fc2_w"] = p["fc2_w"].T.astype(jnp.bfloat16)                        # (64, 32)
    w["fc2_b"] = p["fc2_b"].reshape(1, -1).astype(jnp.float32)
    w["fc3_w"] = p["fc3_w"].reshape(1, -1).astype(jnp.float32)            # (1, 32)
    w["fc3_b"] = p["fc3_b"].reshape(1, 1).astype(jnp.float32)
    return w


# ---------------------------------------------------------------------------
# Forward pass (mirrors CaloganPhysicsDiscriminator.forward)
# ---------------------------------------------------------------------------
def add_angle_and_norm(point):
    # TODO(synk): aux.add_angle_and_norm source not provided; assumed
    # cat([point, atan2(y, x), ||point||_2], dim=1) -> (N, 4).
    angle = jnp.arctan2(point[:, 1:2], point[:, 0:1])
    norm = jnp.sqrt(jnp.sum(point * point, axis=1, keepdims=True))
    return jnp.concatenate([point, angle, norm], axis=1)


def calogan_discriminator_forward(w, energy_deposit, y,
                                  add_points_norms_and_angles=True, slope=0.01):
    point, momentum = y
    if add_points_norms_and_angles:
        point = add_angle_and_norm(point)

    # NCHW -> NHWC once; all conv layers stay NHWC (channels on lanes).
    x = jnp.transpose(energy_deposit, (0, 2, 3, 1)).astype(jnp.bfloat16)
    x = conv2d_leaky(x, w["conv1_w"], w["conv1_b"], stride=2, pad=1, slope=slope)
    x = conv2d_leaky(x, w["conv2_w"], w["conv2_b"], stride=2, pad=0, slope=slope)
    x = conv2d_leaky(x, w["conv3_w"], w["conv3_b"], stride=2, pad=0, slope=slope)
    x = conv2d_leaky(x, w["conv4_w"], w["conv4_b"], stride=2, pad=0, slope=slope)

    n = energy_deposit.shape[0]
    feat = x.reshape(n, 256)                         # (N,1,1,256) -> (N,256), free

    # torch.cat([X, momentum, point]) is realised by splitting fc1's weight:
    # columns [0:256] -> fc1_wa (feat), columns [256:] -> fc1_wc (cond).
    cond = jnp.concatenate([momentum, point], axis=1)           # (N, 7) or (N, 5)
    cpad = w["fc1_wc"].shape[0]
    cond = (jnp.zeros((n, cpad), jnp.float32)
            .at[:, :cond.shape[1]].set(cond.astype(jnp.float32))
            .astype(jnp.bfloat16))

    return fc_head(feat.astype(jnp.bfloat16), cond, w, slope=slope)   # (N, 1) f32


if __name__ == "__main__":
    key = jax.random.PRNGKey(0)
    k_ed, k_pt, k_mo, k_par = jax.random.split(key, 4)

    # CaloGAN images are 30x30 (so conv4 output is 1x1 -> reshape(-1, 256)).
    batch = 2
    energy_deposit = jax.random.normal(k_ed, (batch, 1, 30, 30), jnp.float32)
    point = jax.random.normal(k_pt, (batch, 2), jnp.float32)
    momentum = jax.random.normal(k_mo, (batch, 3), jnp.float32)

    params = init_params(k_par, add_points_norms_and_angles=True)
    prepared = prepare_params(params)

    fwd = jax.jit(calogan_discriminator_forward)
    out = jax.block_until_ready(fwd(prepared, energy_deposit, (point, momentum)))
    assert out.shape == (batch, 1), out.shape
    assert bool(jnp.all(jnp.isfinite(out)))
    print("KERNEL_OK")
</pallas_src>

<mosaic_0001>
module attributes {stable_mosaic.version = 11 : i64} {
  func.func @_matmul_bias_act_kernel(%arg0: i32, %arg1: memref<450x9xbf16, #tpu.memory_space<vmem>>, %arg2: memref<9x32xbf16, #tpu.memory_space<vmem>>, %arg3: memref<1x32xf32, #tpu.memory_space<vmem>>, %arg4: memref<450x32xbf16, #tpu.memory_space<vmem>>) attributes {dimension_semantics = [#tpu.dimension_semantics<parallel>], iteration_bounds = array<i64: 1>, scalar_prefetch = 0 : i64, scratch_operands = 0 : i64, tpu.core_type = #tpu.core_type<tc>, window_params = [{transform_indices = @transform_0, window_bounds = array<i64: 450, 9>}, {pipeline_mode = #tpu.pipeline_mode<synchronous>, transform_indices = @transform_1, window_bounds = array<i64: 9, 32>}, {pipeline_mode = #tpu.pipeline_mode<synchronous>, transform_indices = @transform_2, window_bounds = array<i64: 1, 32>}, {transform_indices = @transform_3, window_bounds = array<i64: 450, 32>}]} {
    %c0 = arith.constant 0 : index
    %c0_0 = arith.constant 0 : index
    %0 = vector.load %arg1[%c0, %c0_0] : memref<450x9xbf16, #tpu.memory_space<vmem>>, vector<450x9xbf16>
    %c0_1 = arith.constant 0 : index
    %c0_2 = arith.constant 0 : index
    %1 = vector.load %arg2[%c0_1, %c0_2] : memref<9x32xbf16, #tpu.memory_space<vmem>>, vector<9x32xbf16>
    %cst = arith.constant dense<0.000000e+00> : vector<450x32xf32>
    %2 = tpu.matmul %0, %1, %cst {dimension_numbers = #tpu.dot_dimension_numbers<[1], [0], [0], [1], [0, 0, 1, 1], [], []>} : vector<450x9xbf16>, vector<9x32xbf16>, vector<450x32xf32> -> vector<450x32xf32>
    %c0_3 = arith.constant 0 : index
    %c0_4 = arith.constant 0 : index
    %3 = vector.load %arg3[%c0_3, %c0_4] : memref<1x32xf32, #tpu.memory_space<vmem>>, vector<1x32xf32>
    %4 = vector.broadcast %3 : vector<1x32xf32> to vector<450x32xf32>
    %5 = arith.addf %2, %4 : vector<450x32xf32>
    %cst_5 = arith.constant 0.000000e+00 : f32
    %6 = vector.broadcast %cst_5 : f32 to vector<450x32xf32>
    %7 = arith.cmpf ogt, %5, %6 : vector<450x32xf32>
    %cst_6 = arith.constant 0.00999999977 : f32
    %8 = vector.broadcast %cst_6 : f32 to vector<450x32xf32>
    %9 = arith.mulf %8, %5 : vector<450x32xf32>
    %10 = arith.select %7, %5, %9 : vector<450x32xi1>, vector<450x32xf32>
    %11 = arith.truncf %10 : vector<450x32xf32> to vector<450x32xbf16>
    %c0_7 = arith.constant 0 : index
    %c0_8 = arith.constant 0 : index
    %12 = vector.load %arg4[%c0_7, %c0_8] : memref<450x32xbf16, #tpu.memory_space<vmem>>, vector<450x32xbf16>
    tpu.vector_store %arg4[%c0_7, %c0_8], %11 {strides = array<i32>} : memref<450x32xbf16, #tpu.memory_space<vmem>>, vector<450x32xbf16>,
    return
  }
  func.func @transform_0(%arg0: i32) -> (i32, i32) {
    %c0_i32 = arith.constant 0 : i32
    %c0_i32_0 = arith.constant 0 : i32
    return %arg0, %c0_i32 : i32, i32
  }
  func.func @transform_1(%arg0: i32) -> (i32, i32) {
    %c0_i32 = arith.constant 0 : i32
    %c0_i32_0 = arith.constant 0 : i32
    %c0_i32_1 = arith.constant 0 : i32
    return %c0_i32, %c0_i32_0 : i32, i32
  }
  func.func @transform_2(%arg0: i32) -> (i32, i32) {
    %c0_i32 = arith.constant 0 : i32
    %c0_i32_0 = arith.constant 0 : i32
    %c0_i32_1 = arith.constant 0 : i32
    return %c0_i32, %c0_i32_0 : i32, i32
  }
  func.func @transform_3(%arg0: i32) -> (i32, i32) {
    %c0_i32 = arith.constant 0 : i32
    %c0_i32_0 = arith.constant 0 : i32
    return %arg0, %c0_i32 : i32, i32
  }
}

module attributes {stable_mosaic.version = 11 : i64} {
  func.func @_matmul_bias_act_kernel(%arg0: i32, %arg1: memref<98x288xbf16, #tpu.memory_space<vmem>>, %arg2: memref<288x64xbf16, #tpu.memory_space<vmem>>, %arg3: memref<1x64xf32, #tpu.memory_space<vmem>>, %arg4: memref<98x64xbf16, #tpu.memory_space<vmem>>) attributes {dimension_semantics = [#tpu.dimension_semantics<parallel>], iteration_bounds = array<i64: 1>, scalar_prefetch = 0 : i64, scratch_operands = 0 : i64, tpu.core_type = #tpu.core_type<tc>, window_params = [{transform_indices = @transform_0, window_bounds = array<i64: 98, 288>}, {pipeline_mode = #tpu.pipeline_mode<synchronous>, transform_indices = @transform_1, window_bounds = array<i64: 288, 64>}, {pipeline_mode = #tpu.pipeline_mode<synchronous>, transform_indices = @transform_2, window_bounds = array<i64: 1, 64>}, {transform_indices = @transform_3, window_bounds = array<i64: 98, 64>}]} {
    %c0 = arith.constant 0 : index
    %c0_0 = arith.constant 0 : index
    %0 = vector.load %arg1[%c0, %c0_0] : memref<98x288xbf16, #tpu.memory_space<vmem>>, vector<98x288xbf16>
    %c0_1 = arith.constant 0 : index
    %c0_2 = arith.constant 0 : index
    %1 = vector.load %arg2[%c0_1, %c0_2] : memref<288x64xbf16, #tpu.memory_space<vmem>>, vector<288x64xbf16>
    %cst = arith.constant dense<0.000000e+00> : vector<98x64xf32>
    %2 = tpu.matmul %0, %1, %cst {dimension_numbers = #tpu.dot_dimension_numbers<[1], [0], [0], [1], [0, 0, 1, 1], [], []>} : vector<98x288xbf16>, vector<288x64xbf16>, vector<98x64xf32> -> vector<98x64xf32>
    %c0_3 = arith.constant 0 : index
    %c0_4 = arith.constant 0 : index
    %3 = vector.load %arg3[%c0_3, %c0_4] : memref<1x64xf32, #tpu.memory_space<vmem>>, vector<1x64xf32>
    %4 = vector.broadcast %3 : vector<1x64xf32> to vector<98x64xf32>
    %5 = arith.addf %2, %4 : vector<98x64xf32>
    %cst_5 = arith.constant 0.000000e+00 : f32
    %6 = vector.broadcast %cst_5 : f32 to vector<98x64xf32>
    %7 = arith.cmpf ogt, %5, %6 : vector<98x64xf32>
    %cst_6 = arith.constant 0.00999999977 : f32
    %8 = vector.broadcast %cst_6 : f32 to vector<98x64xf32>
    %9 = arith.mulf %8, %5 : vector<98x64xf32>
    %10 = arith.select %7, %5, %9 : vector<98x64xi1>, vector<98x64xf32>
    %11 = arith.truncf %10 : vector<98x64xf32> to vector<98x64xbf16>
    %c0_7 = arith.constant 0 : index
    %c0_8 = arith.constant 0 : index
    %12 = vector.load %arg4[%c0_7, %c0_8] : memref<98x64xbf16, #tpu.memory_space<vmem>>, vector<98x64xbf16>
    tpu.vector_store %arg4[%c0_7, %c0_8], %11 {strides = array<i32>} : memref<98x64xbf16, #tpu.memory_space<vmem>>, vector<98x64xbf16>,
    return
  }
  func.func @transform_0(%arg0: i32) -> (i32, i32) {
    %c0_i32 = arith.constant 0 : i32
    %c0_i32_0 = arith.constant 0 : i32
    return %arg0, %c0_i32 : i32, i32
  }
  func.func @transform_1(%arg0: i32) -> (i32, i32) {
    %c0_i32 = arith.constant 0 : i32
    %c0_i32_0 = arith.constant 0 : i32
    %c0_i32_1 = arith.constant 0 : i32
    return %c0_i32, %c0_i32_0 : i32, i32
  }
  func.func @transform_2(%arg0: i32) -> (i32, i32) {
    %c0_i32 = arith.constant 0 : i32
    %c0_i32_0 = arith.constant 0 : i32
    %c0_i32_1 = arith.constant 0 : i32
    return %c0_i32, %c0_i32_0 : i32, i32
  }
  func.func @transform_3(%arg0: i32) -> (i32, i32) {
    %c0_i32 = arith.constant 0 : i32
    %c0_i32_0 = arith.constant 0 : i32
    return %arg0, %c0_i32 : i32, i32
  }
}

module attributes {stable_mosaic.version = 11 : i64} {
  func.func @_matmul_bias_act_kernel(%arg0: i32, %arg1: memref<18x576xbf16, #tpu.memory_space<vmem>>, %arg2: memref<576x128xbf16, #tpu.memory_space<vmem>>, %arg3: memref<1x128xf32, #tpu.memory_space<vmem>>, %arg4: memref<18x128xbf16, #tpu.memory_space<vmem>>) attributes {dimension_semantics = [#tpu.dimension_semantics<parallel>], iteration_bounds = array<i64: 1>, scalar_prefetch = 0 : i64, scratch_operands = 0 : i64, tpu.core_type = #tpu.core_type<tc>, window_params = [{transform_indices = @transform_0, window_bounds = array<i64: 18, 576>}, {pipeline_mode = #tpu.pipeline_mode<synchronous>, transform_indices = @transform_1, window_bounds = array<i64: 576, 128>}, {pipeline_mode = #tpu.pipeline_mode<synchronous>, transform_indices = @transform_2, window_bounds = array<i64: 1, 128>}, {transform_indices = @transform_3, window_bounds = array<i64: 18, 128>}]} {
    %c0 = arith.constant 0 : index
    %c0_0 = arith.constant 0 : index
    %0 = vector.load %arg1[%c0, %c0_0] : memref<18x576xbf16, #tpu.memory_space<vmem>>, vector<18x576xbf16>
    %c0_1 = arith.constant 0 : index
    %c0_2 = arith.constant 0 : index
    %1 = vector.load %arg2[%c0_1, %c0_2] : memref<576x128xbf16, #tpu.memory_space<vmem>>, vector<576x128xbf16>
    %cst = arith.constant dense<0.000000e+00> : vector<18x128xf32>
    %2 = tpu.matmul %0, %1, %cst {dimension_numbers = #tpu.dot_dimension_numbers<[1], [0], [0], [1], [0, 0, 1, 1], [], []>} : vector<18x576xbf16>, vector<576x128xbf16>, vector<18x128xf32> -> vector<18x128xf32>
    %c0_3 = arith.constant 0 : index
    %c0_4 = arith.constant 0 : index
    %3 = vector.load %arg3[%c0_3, %c0_4] : memref<1x128xf32, #tpu.memory_space<vmem>>, vector<1x128xf32>
    %4 = vector.broadcast %3 : vector<1x128xf32> to vector<18x128xf32>
    %5 = arith.addf %2, %4 : vector<18x128xf32>
    %cst_5 = arith.constant 0.000000e+00 : f32
    %6 = vector.broadcast %cst_5 : f32 to vector<18x128xf32>
    %7 = arith.cmpf ogt, %5, %6 : vector<18x128xf32>
    %cst_6 = arith.constant 0.00999999977 : f32
    %8 = vector.broadcast %cst_6 : f32 to vector<18x128xf32>
    %9 = arith.mulf %8, %5 : vector<18x128xf32>
    %10 = arith.select %7, %5, %9 : vector<18x128xi1>, vector<18x128xf32>
    %11 = arith.truncf %10 : vector<18x128xf32> to vector<18x128xbf16>
    %c0_7 = arith.constant 0 : index
    %c0_8 = arith.constant 0 : index
    %12 = vector.load %arg4[%c0_7, %c0_8] : memref<18x128xbf16, #tpu.memory_space<vmem>>, vector<18x128xbf16>
    tpu.vector_store %arg4[%c0_7, %c0_8], %11 {strides = array<i32>} : memref<18x128xbf16, #tpu.memory_space<vmem>>, vector<18x128xbf16>,
    return
  }
  func.func @transform_0(%arg0: i32) -> (i32, i32) {
    %c0_i32 = arith.constant 0 : i32
    %c0_i32_0 = arith.constant 0 : i32
    return %arg0, %c0_i32 : i32, i32
  }
  func.func @transform_1(%arg0: i32) -> (i32, i32) {
    %c0_i32 = arith.constant 0 : i32
    %c0_i32_0 = arith.constant 0 : i32
    %c0_i32_1 = arith.constant 0 : i32
    return %c0_i32, %c0_i32_0 : i32, i32
  }
  func.func @transform_2(%arg0: i32) -> (i32, i32) {
    %c0_i32 = arith.constant 0 : i32
    %c0_i32_0 = arith.constant 0 : i32
    %c0_i32_1 = arith.constant 0 : i32
    return %c0_i32, %c0_i32_0 : i32, i32
  }
  func.func @transform_3(%arg0: i32) -> (i32, i32) {
    %c0_i32 = arith.constant 0 : i32
    %c0_i32_0 = arith.constant 0 : i32
    return %arg0, %c0_i32 : i32, i32
  }
}

module attributes {stable_mosaic.version = 11 : i64} {
  func.func @_matmul_bias_act_kernel(%arg0: i32, %arg1: memref<2x1152xbf16, #tpu.memory_space<vmem>>, %arg2: memref<1152x256xbf16, #tpu.memory_space<vmem>>, %arg3: memref<1x256xf32, #tpu.memory_space<vmem>>, %arg4: memref<2x256xbf16, #tpu.memory_space<vmem>>) attributes {dimension_semantics = [#tpu.dimension_semantics<parallel>], iteration_bounds = array<i64: 1>, scalar_prefetch = 0 : i64, scratch_operands = 0 : i64, tpu.core_type = #tpu.core_type<tc>, window_params = [{transform_indices = @transform_0, window_bounds = array<i64: 2, 1152>}, {pipeline_mode = #tpu.pipeline_mode<synchronous>, transform_indices = @transform_1, window_bounds = array<i64: 1152, 256>}, {pipeline_mode = #tpu.pipeline_mode<synchronous>, transform_indices = @transform_2, window_bounds = array<i64: 1, 256>}, {transform_indices = @transform_3, window_bounds = array<i64: 2, 256>}]} {
    %c0 = arith.constant 0 : index
    %c0_0 = arith.constant 0 : index
    %0 = vector.load %arg1[%c0, %c0_0] : memref<2x1152xbf16, #tpu.memory_space<vmem>>, vector<2x1152xbf16>
    %c0_1 = arith.constant 0 : index
    %c0_2 = arith.constant 0 : index
    %1 = vector.load %arg2[%c0_1, %c0_2] : memref<1152x256xbf16, #tpu.memory_space<vmem>>, vector<1152x256xbf16>
    %cst = arith.constant dense<0.000000e+00> : vector<2x256xf32>
    %2 = tpu.matmul %0, %1, %cst {dimension_numbers = #tpu.dot_dimension_numbers<[1], [0], [0], [1], [0, 0, 1, 1], [], []>} : vector<2x1152xbf16>, vector<1152x256xbf16>, vector<2x256xf32> -> vector<2x256xf32>
    %c0_3 = arith.constant 0 : index
    %c0_4 = arith.constant 0 : index
    %3 = vector.load %arg3[%c0_3, %c0_4] : memref<1x256xf32, #tpu.memory_space<vmem>>, vector<1x256xf32>
    %4 = vector.broadcast %3 : vector<1x256xf32> to vector<2x256xf32>
    %5 = arith.addf %2, %4 : vector<2x256xf32>
    %cst_5 = arith.constant 0.000000e+00 : f32
    %6 = vector.broadcast %cst_5 : f32 to vector<2x256xf32>
    %7 = arith.cmpf ogt, %5, %6 : vector<2x256xf32>
    %cst_6 = arith.constant 0.00999999977 : f32
    %8 = vector.broadcast %cst_6 : f32 to vector<2x256xf32>
    %9 = arith.mulf %8, %5 : vector<2x256xf32>
    %10 = arith.select %7, %5, %9 : vector<2x256xi1>, vector<2x256xf32>
    %11 = arith.truncf %10 : vector<2x256xf32> to vector<2x256xbf16>
    %c0_7 = arith.constant 0 : index
    %c0_8 = arith.constant 0 : index
    %12 = vector.load %arg4[%c0_7, %c0_8] : memref<2x256xbf16, #tpu.memory_space<vmem>>, vector<2x256xbf16>
    tpu.vector_store %arg4[%c0_7, %c0_8], %11 {strides = array<i32>} : memref<2x256xbf16, #tpu.memory_space<vmem>>, vector<2x256xbf16>,
    return
  }
  func.func @transform_0(%arg0: i32) -> (i32, i32) {
    %c0_i32 = arith.constant 0 : i32
    %c0_i32_0 = arith.constant 0 : i32
    return %arg0, %c0_i32 : i32, i32
  }
  func.func @transform_1(%arg0: i32) -> (i32, i32) {
    %c0_i32 = arith.constant 0 : i32
    %c0_i32_0 = arith.constant 0 : i32
    %c0_i32_1 = arith.constant 0 : i32
    return %c0_i32, %c0_i32_0 : i32, i32
  }
  func.func @transform_2(%arg0: i32) -> (i32, i32) {
    %c0_i32 = arith.constant 0 : i32
    %c0_i32_0 = arith.constant 0 : i32
    %c0_i32_1 = arith.constant 0 : i32
    return %c0_i32, %c0_i32_0 : i32, i32
  }
  func.func @transform_3(%arg0: i32) -> (i32, i32) {
    %c0_i32 = arith.constant 0 : i32
    %c0_i32_0 = arith.constant 0 : i32
    return %arg0, %c0_i32 : i32, i32
  }
}

module attributes {stable_mosaic.version = 11 : i64} {
  func.func @_fc_head_kernel(%arg0: i32, %arg1: memref<2x256xbf16, #tpu.memory_space<vmem>>, %arg2: memref<2x8xbf16, #tpu.memory_space<vmem>>, %arg3: memref<256x64xbf16, #tpu.memory_space<vmem>>, %arg4: memref<8x64xbf16, #tpu.memory_space<vmem>>, %arg5: memref<1x64xf32, #tpu.memory_space<vmem>>, %arg6: memref<64x32xbf16, #tpu.memory_space<vmem>>, %arg7: memref<1x32xf32, #tpu.memory_space<vmem>>, %arg8: memref<1x32xf32, #tpu.memory_space<vmem>>, %arg9: memref<1x1xf32, #tpu.memory_space<vmem>>, %arg10: memref<2x1xf32, #tpu.memory_space<vmem>>) attributes {dimension_semantics = [#tpu.dimension_semantics<parallel>], iteration_bounds = array<i64: 1>, scalar_prefetch = 0 : i64, scratch_operands = 0 : i64, tpu.core_type = #tpu.core_type<tc>, window_params = [{transform_indices = @transform_0, window_bounds = array<i64: 2, 256>}, {transform_indices = @transform_1, window_bounds = array<i64: 2, 8>}, {pipeline_mode = #tpu.pipeline_mode<synchronous>, transform_indices = @transform_2, window_bounds = array<i64: 256, 64>}, {pipeline_mode = #tpu.pipeline_mode<synchronous>, transform_indices = @transform_3, window_bounds = array<i64: 8, 64>}, {pipeline_mode = #tpu.pipeline_mode<synchronous>, transform_indices = @transform_4, window_bounds = array<i64: 1, 64>}, {pipeline_mode = #tpu.pipeline_mode<synchronous>, transform_indices = @transform_5, window_bounds = array<i64: 64, 32>}, {pipeline_mode = #tpu.pipeline_mode<synchronous>, transform_indices = @transform_6, window_bounds = array<i64: 1, 32>}, {pipeline_mode = #tpu.pipeline_mode<synchronous>, transform_indices = @transform_7, window_bounds = array<i64: 1, 32>}, {pipeline_mode = #tpu.pipeline_mode<synchronous>, transform_indices = @transform_8, window_bounds = array<i64: 1, 1>}, {transform_indices = @transform_9, window_bounds = array<i64: 2, 1>}]} {
    %c0 = arith.constant 0 : index
    %c0_0 = arith.constant 0 : index
    %0 = vector.load %arg1[%c0, %c0_0] : memref<2x256xbf16, #tpu.memory_space<vmem>>, vector<2x256xbf16>
    %c0_1 = arith.constant 0 : index
    %c0_2 = arith.constant 0 : index
    %1 = vector.load %arg3[%c0_1, %c0_2] : memref<256x64xbf16, #tpu.memory_space<vmem>>, vector<256x64xbf16>
    %cst = arith.constant dense<0.000000e+00> : vector<2x64xf32>
    %2 = tpu.matmul %0, %1, %cst {dimension_numbers = #tpu.dot_dimension_numbers<[1], [0], [0], [1], [0, 0, 1, 1], [], []>} : vector<2x256xbf16>, vector<256x64xbf16>, vector<2x64xf32> -> vector<2x64xf32>
    %c0_3 = arith.constant 0 : index
    %c0_4 = arith.constant 0 : index
    %3 = vector.load %arg2[%c0_3, %c0_4] : memref<2x8xbf16, #tpu.memory_space<vmem>>, vector<2x8xbf16>
    %c0_5 = arith.constant 0 : index
    %c0_6 = arith.constant 0 : index
    %4 = vector.load %arg4[%c0_5, %c0_6] : memref<8x64xbf16, #tpu.memory_space<vmem>>, vector<8x64xbf16>
    %cst_7 = arith.constant dense<0.000000e+00> : vector<2x64xf32>
    %5 = tpu.matmul %3, %4, %cst_7 {dimension_numbers = #tpu.dot_dimension_numbers<[1], [0], [0], [1], [0, 0, 1, 1], [], []>} : vector<2x8xbf16>, vector<8x64xbf16>, vector<2x64xf32> -> vector<2x64xf32>
    %6 = arith.addf %2, %5 : vector<2x64xf32>
    %c0_8 = arith.constant 0 : index
    %c0_9 = arith.constant 0 : index
    %7 = vector.load %arg5[%c0_8, %c0_9] : memref<1x64xf32, #tpu.memory_space<vmem>>, vector<1x64xf32>
    %8 = vector.broadcast %7 : vector<1x64xf32> to vector<2x64xf32>
    %9 = arith.addf %6, %8 : vector<2x64xf32>
    %cst_10 = arith.constant 0.000000e+00 : f32
    %10 = vector.broadcast %cst_10 : f32 to vector<2x64xf32>
    %11 = arith.cmpf ogt, %9, %10 : vector<2x64xf32>
    %cst_11 = arith.constant 0.00999999977 : f32
    %12 = vector.broadcast %cst_11 : f32 to vector<2x64xf32>
    %13 = arith.mulf %12, %9 : vector<2x64xf32>
    %14 = arith.select %11, %9, %13 : vector<2x64xi1>, vector<2x64xf32>
    %15 = arith.truncf %14 : vector<2x64xf32> to vector<2x64xbf16>
    %c0_12 = arith.constant 0 : index
    %c0_13 = arith.constant 0 : index
    %16 = vector.load %arg6[%c0_12, %c0_13] : memref<64x32xbf16, #tpu.memory_space<vmem>>, vector<64x32xbf16>
    %cst_14 = arith.constant dense<0.000000e+00> : vector<2x32xf32>
    %17 = tpu.matmul %15, %16, %cst_14 {dimension_numbers = #tpu.dot_dimension_numbers<[1], [0], [0], [1], [0, 0, 1, 1], [], []>} : vector<2x64xbf16>, vector<64x32xbf16>, vector<2x32xf32> -> vector<2x32xf32>
    %c0_15 = arith.constant 0 : index
    %c0_16 = arith.constant 0 : index
    %18 = vector.load %arg7[%c0_15, %c0_16] : memref<1x32xf32, #tpu.memory_space<vmem>>, vector<1x32xf32>
    %19 = vector.broadcast %18 : vector<1x32xf32> to vector<2x32xf32>
    %20 = arith.addf %17, %19 : vector<2x32xf32>
    %cst_17 = arith.constant 0.000000e+00 : f32
    %21 = vector.broadcast %cst_17 : f32 to vector<2x32xf32>
    %22 = arith.cmpf ogt, %20, %21 : vector<2x32xf32>
    %cst_18 = arith.constant 0.00999999977 : f32
    %23 = vector.broadcast %cst_18 : f32 to vector<2x32xf32>
    %24 = arith.mulf %23, %20 : vector<2x32xf32>
    %25 = arith.select %22, %20, %24 : vector<2x32xi1>, vector<2x32xf32>
    %c0_19 = arith.constant 0 : index
    %c0_20 = arith.constant 0 : index
    %26 = vector.load %arg8[%c0_19, %c0_20] : memref<1x32xf32, #tpu.memory_space<vmem>>, vector<1x32xf32>
    %27 = vector.broadcast %26 : vector<1x32xf32> to vector<2x32xf32>
    %28 = arith.mulf %25, %27 : vector<2x32xf32>
    %cst_21 = arith.constant dense<0.000000e+00> : vector<2xf32>
    %29 = vector.multi_reduction <add>, %28, %cst_21 [1] : vector<2x32xf32> to vector<2xf32>
    %30 = vector.shape_cast %29 : vector<2xf32> to vector<2x1xf32>
    %c0_22 = arith.constant 0 : index
    %c0_23 = arith.constant 0 : index
    %31 = vector.load %arg9[%c0_22, %c0_23] : memref<1x1xf32, #tpu.memory_space<vmem>>, vector<1x1xf32>
    %32 = vector.broadcast %31 : vector<1x1xf32> to vector<2x1xf32>
    %33 = arith.addf %30, %32 : vector<2x1xf32>
    %c0_24 = arith.constant 0 : index
    %c0_25 = arith.constant 0 : index
    %34 = vector.load %arg10[%c0_24, %c0_25] : memref<2x1xf32, #tpu.memory_space<vmem>>, vector<2x1xf32>
    tpu.vector_store %arg10[%c0_24, %c0_25], %33 {strides = array<i32>} : memref<2x1xf32, #tpu.memory_space<vmem>>, vector<2x1xf32>,
    return
  }
  func.func @transform_0(%arg0: i32) -> (i32, i32) {
    %c0_i32 = arith.constant 0 : i32
    %c0_i32_0 = arith.constant 0 : i32
    return %arg0, %c0_i32 : i32, i32
  }
  func.func @transform_1(%arg0: i32) -> (i32, i32) {
    %c0_i32 = arith.constant 0 : i32
    %c0_i32_0 = arith.constant 0 : i32
    return %arg0, %c0_i32 : i32, i32
  }
  func.func @transform_2(%arg0: i32) -> (i32, i32) {
    %c0_i32 = arith.constant 0 : i32
    %c0_i32_0 = arith.constant 0 : i32
    %c0_i32_1 = arith.constant 0 : i32
    return %c0_i32, %c0_i32_0 : i32, i32
  }
  func.func @transform_3(%arg0: i32) -> (i32, i32) {
    %c0_i32 = arith.constant 0 : i32
    %c0_i32_0 = arith.constant 0 : i32
    %c0_i32_1 = arith.constant 0 : i32
    return %c0_i32, %c0_i32_0 : i32, i32
  }
  func.func @transform_4(%arg0: i32) -> (i32, i32) {
    %c0_i32 = arith.constant 0 : i32
    %c0_i32_0 = arith.constant 0 : i32
    %c0_i32_1 = arith.constant 0 : i32
    return %c0_i32, %c0_i32_0 : i32, i32
  }
  func.func @transform_5(%arg0: i32) -> (i32, i32) {
    %c0_i32 = arith.constant 0 : i32
    %c0_i32_0 = arith.constant 0 : i32
    %c0_i32_1 = arith.constant 0 : i32
    return %c0_i32, %c0_i32_0 : i32, i32
  }
  func.func @transform_6(%arg0: i32) -> (i32, i32) {
    %c0_i32 = arith.constant 0 : i32
    %c0_i32_0 = arith.constant 0 : i32
    %c0_i32_1 = arith.constant 0 : i32
    return %c0_i32, %c0_i32_0 : i32, i32
  }
  func.func @transform_7(%arg0: i32) -> (i32, i32) {
    %c0_i32 = arith.constant 0 : i32
    %c0_i32_0 = arith.constant 0 : i32
    %c0_i32_1 = arith.constant 0 : i32
    return %c0_i32, %c0_i32_0 : i32, i32
  }
  func.func @transform_8(%arg0: i32) -> (i32, i32) {
    %c0_i32 = arith.constant 0 : i32
    %c0_i32_0 = arith.constant 0 : i32
    %c0_i32_1 = arith.constant 0 : i32
    return %c0_i32, %c0_i32_0 : i32, i32
  }
  func.func @transform_9(%arg0: i32) -> (i32, i32) {
    %c0_i32 = arith.constant 0 : i32
    %c0_i32_0 = arith.constant 0 : i32
    return %arg0, %c0_i32 : i32, i32
  }
}

</mosaic_0001>

<bundles_post_ra>
// kernel: calogan_discriminator_forward.5
= control target key start
LH: loop header
LB: loop body
LE: loop exit
PB: predicated region body
PF: predicated region fallthrough
CT: control target
= control target key end

     0   :  { %vm317_vm0 = vcmask 1043456   ;;  %vm318_vm1 = vcmask 1044480   ;;  %v1408_v0 = vmov 0.0   ;;  %v1409_v2 = vmov 65535   ;;  %s1899_s1 = inlined_call_operand.vmem [shape: bf16[9,32], index: 1, kind: input, shape index: {}]   ;;  %s1900_s0 = inlined_call_operand.vmem [shape: bf16[450,9], index: 0, kind: input, shape index: {}]   ;;  %s1901_s2 = inlined_call_operand.vmem [shape: f32[1,32], index: 2, kind: input, shape index: {}]   ;;  %s1902_s3 = inlined_call_operand.vmem [shape: bf16[450,32], index: 3, kind: output, shape index: {}]  }
   0x1   :  { %1255 = vmatprep.subr.bf16.mxu0 %v1408_v0  ;;  %v1378_v1 = vld [vmem:[%s1899_s1] sm:$0x1f]   ;;  %1373 = vmatprep.subr.bf16.mxu1 %v1408_v0  ;;  %v319_v3 = vsel %vm317_vm0, 4294967295, %v1409_v2  ;;  %vm1410_vm2 = vmmov 0   ;;  %v1380_v7 = vld [vmem:[%s1900_s0 + $0x78] sm:$0xff]   ;;  %vm229_vm3 = vcmask 72704  }
   0x2   :  { %v320_v4 = vsel %vm318_vm1, %v319_v3, 0  ;;  %1257 = vmatprep.mubr.msk.bf16.mxu0 %vm1410_vm2, %v1408_v0  ;;  %v1379_v5 = vld [vmem:[%s1900_s0] sm:$0xff]   ;;  %1317 = vmatprep.mubr.msk.bf16.mxu1 %vm1410_vm2, %v1408_v0  ;;  %v1381_v8 = vld [vmem:[%s1900_s0 + $0x8] sm:$0xff]   ;;  %v1383_v10 = vld [vmem:[%s1900_s0 + $0x10] sm:$0xff]   ;;  %vm988_vm6 = vcmask 257024  }
   0x3   :  { %v322_v6 = vand.u32 %v1378_v1, %v320_v4  ;;  %v1382_v9 = vld [vmem:[%s1900_s0 + $0x80] sm:$0xff]   ;;  %v1384_v11 = vld [vmem:[%s1900_s0 + $0x88] sm:$0xff]   ;;  %v1385_v12 = vld [vmem:[%s1900_s0 + $0x18] sm:$0xff]  }
   0x4   :  { %v1386_v13 = vld [vmem:[%s1900_s0 + $0x90] sm:$0xff]   ;;  %v1387_v14 = vld [vmem:[%s1900_s0 + $0x20] sm:$0xff]   ;;  %v1388_v15 = vld [vmem:[%s1900_s0 + $0x98] sm:$0xff]  }
   0x5   :  { %1256 = vmatpush3.bf16.msra.mxu0 %v322_v6  ;;  %1374 = vmatpush3.bf16.msra.mxu1 %v322_v6  ;;  %v1389_v16 = vld [vmem:[%s1900_s0 + $0x28] sm:$0xff]   ;;  %v1390_v17 = vld [vmem:[%s1900_s0 + $0xa0] sm:$0xff]   ;;  %v1391_v18 = vld [vmem:[%s1900_s0 + $0x30] sm:$0xff]  }
   0x6   :  { %v1392_v19 = vld [vmem:[%s1900_s0 + $0xa8] sm:$0xff]   ;;  %v1393_v20 = vld [vmem:[%s1900_s0 + $0x38] sm:$0xff]   ;;  %v1394_v21 = vld [vmem:[%s1900_s0 + $0xb0] sm:$0xff]  }
   0x7   :  { %v1395_v22 = vld [vmem:[%s1900_s0 + $0x40] sm:$0xff]   ;;  %v1396_v23 = vld [vmem:[%s1900_s0 + $0xb8] sm:$0xff]   ;;  %v1397_v24 = vld [vmem:[%s1900_s0 + $0x48] sm:$0xff]  }
   0x8   :  { %1258 = vmatmul.mubr.msk.bf16.vlgmr.msra.gmra.mxu0 %vm229_vm3, %v1379_v5  ;;  %1318 = vmatmul.mubr.msk.bf16.vlgmr.msra.gmra.mxu1 %vm229_vm3, %v1380_v7  ;;  %v1398_v25 = vld [vmem:[%s1900_s0 + $0xc0] sm:$0xff]   ;;  %v1399_v26 = vld [vmem:[%s1900_s0 + $0x50] sm:$0xff]   ;;  %v1400_v27 = vld [vmem:[%s1900_s0 + $0xc8] sm:$0xff]  }
   0x9   :  { %1261 = vmatprep.mubr.msk.bf16.mxu0 %vm1410_vm2, %v1408_v0  ;;  %1321 = vmatprep.mubr.msk.bf16.mxu1 %vm1410_vm2, %v1408_v0  ;;  %v1401_v28 = vld [vmem:[%s1900_s0 + $0x58] sm:$0xff]   ;;  %v1402_v29 = vld [vmem:[%s1900_s0 + $0xd0] sm:$0xff]   ;;  %v1403_v30 = vld [vmem:[%s1900_s0 + $0x60] sm:$0xff]  }
   0xa   :  { %v1404_v31 = vld [vmem:[%s1900_s0 + $0xd8] sm:$0xff]   ;;  %v1405_v32 = vld [vmem:[%s1900_s0 + $0x68] sm:$0xff]   ;;  %v1406_v33 = vld [vmem:[%s1900_s0 + $0xe0] ss:$0 sps:$4 sm:$0x11]  }
   0xb   :  { %v1407_v34 = vld [vmem:[%s1900_s0 + $0x70] sm:$0xff]   ;;  %v1613_v35 = vld [vmem:[%s1901_s2] ss:$0 sm:$0xff] }
  0x10   :  { %1262 = vmatmul.mubr.msk.bf16.gmra.mxu0 %vm229_vm3, %v1381_v8  ;;  %1322 = vmatmul.mubr.msk.bf16.gmra.mxu1 %vm229_vm3, %v1382_v9 }
  0x11   :  { %1265 = vmatprep.mubr.msk.bf16.mxu0 %vm1410_vm2, %v1408_v0  ;;  %1325 = vmatprep.mubr.msk.bf16.mxu1 %vm1410_vm2, %v1408_v0 }
  0x18   :  { %1266 = vmatmul.mubr.msk.bf16.gmra.mxu0 %vm229_vm3, %v1383_v10  ;;  %1326 = vmatmul.mubr.msk.bf16.gmra.mxu1 %vm229_vm3, %v1384_v11 }
  0x19   :  { %1269 = vmatprep.mubr.msk.bf16.mxu0 %vm1410_vm2, %v1408_v0  ;;  %1329 = vmatprep.mubr.msk.bf16.mxu1 %vm1410_vm2, %v1408_v0 }
  0x20   :  { %1270 = vmatmul.mubr.msk.bf16.gmra.mxu0 %vm229_vm3, %v1385_v12  ;;  %1330 = vmatmul.mubr.msk.bf16.gmra.mxu1 %vm229_vm3, %v1386_v13 }
  0x21   :  { %1273 = vmatprep.mubr.msk.bf16.mxu0 %vm1410_vm2, %v1408_v0  ;;  %1333 = vmatprep.mubr.msk.bf16.mxu1 %vm1410_vm2, %v1408_v0 }
  0x28   :  { %1274 = vmatmul.mubr.msk.bf16.gmra.mxu0 %vm229_vm3, %v1387_v14  ;;  %1334 = vmatmul.mubr.msk.bf16.gmra.mxu1 %vm229_vm3, %v1388_v15 }
  0x29   :  { %1277 = vmatprep.mubr.msk.bf16.mxu0 %vm1410_vm2, %v1408_v0  ;;  %1337 = vmatprep.mubr.msk.bf16.mxu1 %vm1410_vm2, %v1408_v0 }
  0x30   :  { %1278 = vmatmul.mubr.msk.bf16.gmra.mxu0 %vm229_vm3, %v1389_v16  ;;  %1338 = vmatmul.mubr.msk.bf16.gmra.mxu1 %vm229_vm3, %v1390_v17 }
  0x31   :  { %1281 = vmatprep.mubr.msk.bf16.mxu0 %vm1410_vm2, %v1408_v0  ;;  %1341 = vmatprep.mubr.msk.bf16.mxu1 %vm1410_vm2, %v1408_v0 }
  0x38   :  { %1282 = vmatmul.mubr.msk.bf16.gmra.mxu0 %vm229_vm3, %v1391_v18  ;;  %1342 = vmatmul.mubr.msk.bf16.gmra.mxu1 %vm229_vm3, %v1392_v19 }
  0x39   :  { %1285 = vmatprep.mubr.msk.bf16.mxu0 %vm1410_vm2, %v1408_v0  ;;  %1345 = vmatprep.mubr.msk.bf16.mxu1 %vm1410_vm2, %v1408_v0 }
  0x40   :  { %1286 = vmatmul.mubr.msk.bf16.gmra.mxu0 %vm229_vm3, %v1393_v20  ;;  %1346 = vmatmul.mubr.msk.bf16.gmra.mxu1 %vm229_vm3, %v1394_v21 }
  0x41   :  { %1289 = vmatprep.mubr.msk.bf16.mxu0 %vm1410_vm2, %v1408_v0  ;;  %1349 = vmatprep.mubr.msk.bf16.mxu1 %vm1410_vm2, %v1408_v0 }
  0x48   :  { %1290 = vmatmul.mubr.msk.bf16.gmra.mxu0 %vm229_vm3, %v1395_v22  ;;  %1350 = vmatmul.mubr.msk.bf16.gmra.mxu1 %vm229_vm3, %v1396_v23 }
  0x49   :  { %1293 = vmatprep.mubr.msk.bf16.mxu0 %vm1410_vm2, %v1408_v0  ;;  %1353 = vmatprep.mubr.msk.bf16.mxu1 %vm1410_vm2, %v1408_v0 }
  0x50   :  { %1294 = vmatmul.mubr.msk.bf16.gmra.mxu0 %vm229_vm3, %v1397_v24  ;;  %1354 = vmatmul.mubr.msk.bf16.gmra.mxu1 %vm229_vm3, %v1398_v25 }
  0x51   :  { %1297 = vmatprep.mubr.msk.bf16.mxu0 %vm1410_vm2, %v1408_v0  ;;  %1357 = vmatprep.mubr.msk.bf16.mxu1 %vm1410_vm2, %v1408_v0 }
  0x58   :  { %1298 = vmatmul.mubr.msk.bf16.gmra.mxu0 %vm229_vm3, %v1399_v26  ;;  %1358 = vmatmul.mubr.msk.bf16.gmra.mxu1 %vm229_vm3, %v1400_v27 }
  0x59   :  { %1301 = vmatprep.mubr.msk.bf16.mxu0 %vm1410_vm2, %v1408_v0  ;;  %1361 = vmatprep.mubr.msk.bf16.mxu1 %vm1410_vm2, %v1408_v0 }
  0x60   :  { %1302 = vmatmul.mubr.msk.bf16.gmra.mxu0 %vm229_vm3, %v1401_v28  ;;  %1362 = vmatmul.mubr.msk.bf16.gmra.mxu1 %vm229_vm3, %v1402_v29 }
  0x61   :  { %1305 = vmatprep.mubr.msk.bf16.mxu0 %vm1410_vm2, %v1408_v0  ;;  %1365 = vmatprep.mubr.msk.bf16.mxu1 %vm1410_vm2, %v1408_v0 }
  0x68   :  { %1306 = vmatmul.mubr.msk.bf16.gmra.mxu0 %vm229_vm3, %v1403_v30  ;;  %1366 = vmatmul.mubr.msk.bf16.gmra.mxu1 %vm229_vm3, %v1404_v31 }
  0x69   :  { %1309 = vmatprep.mubr.msk.bf16.mxu0 %vm1410_vm2, %v1408_v0  ;;  %1369 = vmatprep.mubr.msk.bf16.mxu1 %vm1410_vm2, %v1408_v0 }
  0x70   :  { %1310 = vmatmul.mubr.msk.bf16.gmra.mxu0 %vm229_vm3, %v1405_v32  ;;  %1370 = vmatmul.mubr.msk.bf16.gmra.mxu1 %vm229_vm3, %v1406_v33 }
  0x71   :  { %1313 = vmatprep.mubr.msk.bf16.mxu0 %vm1410_vm2, %v1408_v0 }
  0x78   :  { %1314 = vmatmul.mubr.msk.bf16.gmra.mxu0 %vm229_vm3, %v1407_v34 }
  0xc8   :  { %v358_v36 = vpop.f32.mrf.mxu0  ;;  %v478_v37 = vpop.f32.mrf.mxu1 }
  0xc9   :  { %v359_v38 = vadd.f32 %v1613_v35, %v358_v36  ;;  %v479_v39 = vadd.f32 %v1613_v35, %v478_v37 }
  0xca   :  { %v1259_v40 = vpop.f32.mrf.mxu0  ;;  %v1319_v41 = vpop.f32.mrf.mxu1 }
  0xcb   :  { %vm588_vm4 = vcmp.gt.f32.partialorder %v359_v38, 0.0  ;;  %v645_v42 = vmul.f32 0.01, %v359_v38  ;;  %vm618_vm5 = vcmp.gt.f32.partialorder %v479_v39, 0.0  ;;  %v675_v43 = vmul.f32 0.01, %v479_v39 }
  0xcc   :  { %v361_v44 = vpop.f32.mrf.mxu0  ;;  %v481_v45 = vpop.f32.mrf.mxu1 }
  0xcd   :  { %v702_v46 = vsel %vm588_vm4, %v359_v38, %v645_v42  ;;  %v362_v47 = vadd.f32 %v1613_v35, %v361_v44  ;;  %v732_v48 = vsel %vm618_vm5, %v479_v39, %v675_v43  ;;  %v482_v49 = vadd.f32 %v1613_v35, %v481_v45 }
  0xce   :  { %v1168_v50 = vpack.c.bf16 %v702_v46, %v702_v46  ;;  %v1260_v51 = vpop.f32.mrf.mxu0  ;;  %v1198_v52 = vpack.c.bf16 %v732_v48, %v732_v48  ;;  %v1320_v53 = vpop.f32.mrf.mxu1 }
  0xcf   :  { %vm589_vm7 = vcmp.gt.f32.partialorder %v362_v47, 0.0  ;;  %v646_v54 = vmul.f32 0.01, %v362_v47  ;;  %vm619_vm8 = vcmp.gt.f32.partialorder %v482_v49, 0.0  ;;  %v676_v55 = vmul.f32 0.01, %v482_v49 }
  0xd0   :  { %989 = vst.msk [vmem:[%s1902_s3] sm:$0xf] %vm988_vm6, %v1168_v50  ;;  %1019 = vst.msk [vmem:[%s1902_s3 + $0x78] sm:$0xf] %vm988_vm6, %v1198_v52  ;;  %v366_v56 = vpop.f32.mrf.mxu0  ;;  %v486_v57 = vpop.f32.mrf.mxu1 }
  0xd1   :  { %v703_v58 = vsel %vm589_vm7, %v362_v47, %v646_v54  ;;  %v367_v59 = vadd.f32 %v1613_v35, %v366_v56  ;;  %v733_v60 = vsel %vm619_vm8, %v482_v49, %v676_v55  ;;  %v487_v61 = vadd.f32 %v1613_v35, %v486_v57 }
  0xd2   :  { %v1169_v62 = vpack.c.bf16 %v703_v58, %v703_v58  ;;  %v1263_v63 = vpop.f32.mrf.mxu0  ;;  %v1199_v0 = vpack.c.bf16 %v733_v60, %v733_v60  ;;  %v1323_v1 = vpop.f32.mrf.mxu1 }
  0xd3   :  { %vm590_vm9 = vcmp.gt.f32.partialorder %v367_v59, 0.0  ;;  %v647_v2 = vmul.f32 0.01, %v367_v59  ;;  %vm620_vm10 = vcmp.gt.f32.partialorder %v487_v61, 0.0  ;;  %v677_v3 = vmul.f32 0.01, %v487_v61 }
  0xd4   :  { %990 = vst.msk [vmem:[%s1902_s3 + $0x4] sm:$0xf] %vm988_vm6, %v1169_v62  ;;  %1020 = vst.msk [vmem:[%s1902_s3 + $0x7c] sm:$0xf] %vm988_vm6, %v1199_v0  ;;  %v369_v4 = vpop.f32.mrf.mxu0  ;;  %v489_v5 = vpop.f32.mrf.mxu1 }
  0xd5   :  { %v704_v6 = vsel %vm590_vm9, %v367_v59, %v647_v2  ;;  %v370_v7 = vadd.f32 %v1613_v35, %v369_v4  ;;  %v734_v8 = vsel %vm620_vm10, %v487_v61, %v677_v3  ;;  %v490_v9 = vadd.f32 %v1613_v35, %v489_v5 }
  0xd6   :  { %v1170_v10 = vpack.c.bf16 %v704_v6, %v704_v6  ;;  %v1264_v11 = vpop.f32.mrf.mxu0  ;;  %v1200_v12 = vpack.c.bf16 %v734_v8, %v734_v8  ;;  %v1324_v13 = vpop.f32.mrf.mxu1 }
  0xd7   :  { %vm591_vm11 = vcmp.gt.f32.partialorder %v370_v7, 0.0  ;;  %v648_v14 = vmul.f32 0.01, %v370_v7  ;;  %vm621_vm12 = vcmp.gt.f32.partialorder %v490_v9, 0.0  ;;  %v678_v15 = vmul.f32 0.01, %v490_v9 }
  0xd8   :  { %991 = vst.msk [vmem:[%s1902_s3 + $0x8] sm:$0xf] %vm988_vm6, %v1170_v10  ;;  %1021 = vst.msk [vmem:[%s1902_s3 + $0x80] sm:$0xf] %vm988_vm6, %v1200_v12  ;;  %v374_v16 = vpop.f32.mrf.mxu0  ;;  %v494_v17 = vpop.f32.mrf.mxu1 }
  0xd9   :  { %v705_v18 = vsel %vm591_vm11, %v370_v7, %v648_v14  ;;  %v375_v19 = vadd.f32 %v1613_v35, %v374_v16  ;;  %v735_v20 = vsel %vm621_vm12, %v490_v9, %v678_v15  ;;  %v495_v21 = vadd.f32 %v1613_v35, %v494_v17 }
  0xda   :  { %v1171_v22 = vpack.c.bf16 %v705_v18, %v705_v18  ;;  %v1267_v23 = vpop.f32.mrf.mxu0  ;;  %v1201_v24 = vpack.c.bf16 %v735_v20, %v735_v20  ;;  %v1327_v25 = vpop.f32.mrf.mxu1 }
  0xdb   :  { %vm592_vm13 = vcmp.gt.f32.partialorder %v375_v19, 0.0  ;;  %v649_v26 = vmul.f32 0.01, %v375_v19  ;;  %vm622_vm14 = vcmp.gt.f32.partialorder %v495_v21, 0.0  ;;  %v679_v27 = vmul.f32 0.01, %v495_v21 }
  0xdc   :  { %992 = vst.msk [vmem:[%s1902_s3 + $0xc] sm:$0xf] %vm988_vm6, %v1171_v22  ;;  %1022 = vst.msk [vmem:[%s1902_s3 + $0x84] sm:$0xf] %vm988_vm6, %v1201_v24  ;;  %v377_v28 = vpop.f32.mrf.mxu0  ;;  %v497_v29 = vpop.f32.mrf.mxu1 }
  0xdd   :  { %v706_v30 = vsel %vm592_vm13, %v375_v19, %v649_v26  ;;  %v378_v31 = vadd.f32 %v1613_v35, %v377_v28  ;;  %v736_v32 = vsel %vm622_vm14, %v495_v21, %v679_v27  ;;  %v498_v33 = vadd.f32 %v1613_v35, %v497_v29 }
  0xde   :  { %v1172_v34 = vpack.c.bf16 %v706_v30, %v706_v30  ;;  %v1268_v36 = vpop.f32.mrf.mxu0  ;;  %v1202_v37 = vpack.c.bf16 %v736_v32, %v736_v32  ;;  %v1328_v38 = vpop.f32.mrf.mxu1 }
  0xdf   :  { %vm593_vm15 = vcmp.gt.f32.partialorder %v378_v31, 0.0  ;;  %v650_v39 = vmul.f32 0.01, %v378_v31  ;;  %vm623_vm0 = vcmp.gt.f32.partialorder %v498_v33, 0.0  ;;  %v680_v40 = vmul.f32 0.01, %v498_v33 }
  0xe0   :  { %993 = vst.msk [vmem:[%s1902_s3 + $0x10] sm:$0xf] %vm988_vm6, %v1172_v34  ;;  %1023 = vst.msk [vmem:[%s1902_s3 + $0x88] sm:$0xf] %vm988_vm6, %v1202_v37  ;;  %v382_v41 = vpop.f32.mrf.mxu0  ;;  %v502_v42 = vpop.f32.mrf.mxu1 }
  0xe1   :  { %v707_v43 = vsel %vm593_vm15, %v378_v31, %v650_v39  ;;  %v383_v44 = vadd.f32 %v1613_v35, %v382_v41  ;;  %v737_v45 = vsel %vm623_vm0, %v498_v33, %v680_v40  ;;  %v503_v46 = vadd.f32 %v1613_v35, %v502_v42 }
  0xe2   :  { %v1173_v47 = vpack.c.bf16 %v707_v43, %v707_v43  ;;  %v1271_v48 = vpop.f32.mrf.mxu0  ;;  %v1203_v49 = vpack.c.bf16 %v737_v45, %v737_v45  ;;  %v1331_v50 = vpop.f32.mrf.mxu1 }
  0xe3   :  { %vm594_vm1 = vcmp.gt.f32.partialorder %v383_v44, 0.0  ;;  %v651_v51 = vmul.f32 0.01, %v383_v44  ;;  %vm624_vm2 = vcmp.gt.f32.partialorder %v503_v46, 0.0  ;;  %v681_v52 = vmul.f32 0.01, %v503_v46 }
  0xe4   :  { %994 = vst.msk [vmem:[%s1902_s3 + $0x14] sm:$0xf] %vm988_vm6, %v1173_v47  ;;  %1024 = vst.msk [vmem:[%s1902_s3 + $0x8c] sm:$0xf] %vm988_vm6, %v1203_v49  ;;  %v385_v53 = vpop.f32.mrf.mxu0  ;;  %v505_v54 = vpop.f32.mrf.mxu1 }
  0xe5   :  { %v708_v55 = vsel %vm594_vm1, %v383_v44, %v651_v51  ;;  %v386_v56 = vadd.f32 %v1613_v35, %v385_v53  ;;  %v738_v57 = vsel %vm624_vm2, %v503_v46, %v681_v52  ;;  %v506_v58 = vadd.f32 %v1613_v35, %v505_v54 }
  0xe6   :  { %v1174_v59 = vpack.c.bf16 %v708_v55, %v708_v55  ;;  %v1272_v60 = vpop.f32.mrf.mxu0  ;;  %v1204_v61 = vpack.c.bf16 %v738_v57, %v738_v57  ;;  %v1332_v62 = vpop.f32.mrf.mxu1 }
  0xe7   :  { %vm595_vm3 = vcmp.gt.f32.partialorder %v386_v56, 0.0  ;;  %v652_v63 = vmul.f32 0.01, %v386_v56  ;;  %vm625_vm4 = vcmp.gt.f32.partialorder %v506_v58, 0.0  ;;  %v682_v0 = vmul.f32 0.01, %v506_v58 }
  0xe8   :  { %995 = vst.msk [vmem:[%s1902_s3 + $0x18] sm:$0xf] %vm988_vm6, %v1174_v59  ;;  %1025 = vst.msk [vmem:[%s1902_s3 + $0x90] sm:$0xf] %vm988_vm6, %v1204_v61  ;;  %v390_v1 = vpop.f32.mrf.mxu0  ;;  %v510_v2 = vpop.f32.mrf.mxu1 }
  0xe9   :  { %v709_v3 = vsel %vm595_vm3, %v386_v56, %v652_v63  ;;  %v391_v4 = vadd.f32 %v1613_v35, %v390_v1  ;;  %v739_v5 = vsel %vm625_vm4, %v506_v58, %v682_v0  ;;  %v511_v6 = vadd.f32 %v1613_v35, %v510_v2 }
  0xea   :  { %v1175_v7 = vpack.c.bf16 %v709_v3, %v709_v3  ;;  %v1275_v8 = vpop.f32.mrf.mxu0  ;;  %v1205_v9 = vpack.c.bf16 %v739_v5, %v739_v5  ;;  %v1335_v10 = vpop.f32.mrf.mxu1 }
  0xeb   :  { %vm596_vm5 = vcmp.gt.f32.partialorder %v391_v4, 0.0  ;;  %v653_v11 = vmul.f32 0.01, %v391_v4  ;;  %vm626_vm7 = vcmp.gt.f32.partialorder %v511_v6, 0.0  ;;  %v683_v12 = vmul.f32 0.01, %v511_v6 }
  0xec   :  { %996 = vst.msk [vmem:[%s1902_s3 + $0x1c] sm:$0xf] %vm988_vm6, %v1175_v7  ;;  %1026 = vst.msk [vmem:[%s1902_s3 + $0x94] sm:$0xf] %vm988_vm6, %v1205_v9  ;;  %v393_v13 = vpop.f32.mrf.mxu0  ;;  %v513_v14 = vpop.f32.mrf.mxu1 }
  0xed   :  { %v710_v15 = vsel %vm596_vm5, %v391_v4, %v653_v11  ;;  %v394_v16 = vadd.f32 %v1613_v35, %v393_v13  ;;  %v740_v17 = vsel %vm626_vm7, %v511_v6, %v683_v12  ;;  %v514_v18 = vadd.f32 %v1613_v35, %v513_v14 }
  0xee   :  { %v1176_v19 = vpack.c.bf16 %v710_v15, %v710_v15  ;;  %v1276_v20 = vpop.f32.mrf.mxu0  ;;  %v1206_v21 = vpack.c.bf16 %v740_v17, %v740_v17  ;;  %v1336_v22 = vpop.f32.mrf.mxu1 }
  0xef   :  { %vm597_vm8 = vcmp.gt.f32.partialorder %v394_v16, 0.0  ;;  %v654_v23 = vmul.f32 0.01, %v394_v16  ;;  %vm627_vm9 = vcmp.gt.f32.partialorder %v514_v18, 0.0  ;;  %v684_v24 = vmul.f32 0.01, %v514_v18 }
  0xf0   :  { %997 = vst.msk [vmem:[%s1902_s3 + $0x20] sm:$0xf] %vm988_vm6, %v1176_v19  ;;  %1027 = vst.msk [vmem:[%s1902_s3 + $0x98] sm:$0xf] %vm988_vm6, %v1206_v21  ;;  %v398_v25 = vpop.f32.mrf.mxu0  ;;  %v518_v26 = vpop.f32.mrf.mxu1 }
  0xf1   :  { %v711_v27 = vsel %vm597_vm8, %v394_v16, %v654_v23  ;;  %v399_v28 = vadd.f32 %v1613_v35, %v398_v25  ;;  %v741_v29 = vsel %vm627_vm9, %v514_v18, %v684_v24  ;;  %v519_v30 = vadd.f32 %v1613_v35, %v518_v26 }
  0xf2   :  { %v1177_v31 = vpack.c.bf16 %v711_v27, %v711_v27  ;;  %v1279_v32 = vpop.f32.mrf.mxu0  ;;  %v1207_v33 = vpack.c.bf16 %v741_v29, %v741_v29  ;;  %v1339_v34 = vpop.f32.mrf.mxu1 }
  0xf3   :  { %vm598_vm10 = vcmp.gt.f32.partialorder %v399_v28, 0.0  ;;  %v655_v36 = vmul.f32 0.01, %v399_v28  ;;  %vm628_vm11 = vcmp.gt.f32.partialorder %v519_v30, 0.0  ;;  %v685_v37 = vmul.f32 0.01, %v519_v30 }
  0xf4   :  { %998 = vst.msk [vmem:[%s1902_s3 + $0x24] sm:$0xf] %vm988_vm6, %v1177_v31  ;;  %1028 = vst.msk [vmem:[%s1902_s3 + $0x9c] sm:$0xf] %vm988_vm6, %v1207_v33  ;;  %v401_v38 = vpop.f32.mrf.mxu0  ;;  %v521_v39 = vpop.f32.mrf.mxu1 }
  0xf5   :  { %v712_v40 = vsel %vm598_vm10, %v399_v28, %v655_v36  ;;  %v402_v41 = vadd.f32 %v1613_v35, %v401_v38  ;;  %v742_v42 = vsel %vm628_vm11, %v519_v30, %v685_v37  ;;  %v522_v43 = vadd.f32 %v1613_v35, %v521_v39 }
  0xf6   :  { %v1178_v44 = vpack.c.bf16 %v712_v40, %v712_v40  ;;  %v1280_v45 = vpop.f32.mrf.mxu0  ;;  %v1208_v46 = vpack.c.bf16 %v742_v42, %v742_v42  ;;  %v1340_v47 = vpop.f32.mrf.mxu1 }
  0xf7   :  { %vm599_vm12 = vcmp.gt.f32.partialorder %v402_v41, 0.0  ;;  %v656_v48 = vmul.f32 0.01, %v402_v41  ;;  %vm629_vm13 = vcmp.gt.f32.partialorder %v522_v43, 0.0  ;;  %v686_v49 = vmul.f32 0.01, %v522_v43 }
  0xf8   :  { %999 = vst.msk [vmem:[%s1902_s3 + $0x28] sm:$0xf] %vm988_vm6, %v1178_v44  ;;  %1029 = vst.msk [vmem:[%s1902_s3 + $0xa0] sm:$0xf] %vm988_vm6, %v1208_v46  ;;  %v406_v50 = vpop.f32.mrf.mxu0  ;;  %v526_v51 = vpop.f32.mrf.mxu1 }
  0xf9   :  { %v713_v52 = vsel %vm599_vm12, %v402_v41, %v656_v48  ;;  %v407_v53 = vadd.f32 %v1613_v35, %v406_v50  ;;  %v743_v54 = vsel %vm629_vm13, %v522_v43, %v686_v49  ;;  %v527_v55 = vadd.f32 %v1613_v35, %v526_v51 }
  0xfa   :  { %v1179_v56 = vpack.c.bf16 %v713_v52, %v713_v52  ;;  %v1283_v57 = vpop.f32.mrf.mxu0  ;;  %v1209_v58 = vpack.c.bf16 %v743_v54, %v743_v54  ;;  %v1343_v59 = vpop.f32.mrf.mxu1 }
  0xfb   :  { %vm600_vm14 = vcmp.gt.f32.partialorder %v407_v53, 0.0  ;;  %v657_v60 = vmul.f32 0.01, %v407_v53  ;;  %vm630_vm15 = vcmp.gt.f32.partialorder %v527_v55, 0.0  ;;  %v687_v61 = vmul.f32 0.01, %v527_v55 }
  0xfc   :  { %1000 = vst.msk [vmem:[%s1902_s3 + $0x2c] sm:$0xf] %vm988_vm6, %v1179_v56  ;;  %1030 = vst.msk [vmem:[%s1902_s3 + $0xa4] sm:$0xf] %vm988_vm6, %v1209_v58  ;;  %v409_v62 = vpop.f32.mrf.mxu0  ;;  %v529_v63 = vpop.f32.mrf.mxu1 }
  0xfd   :  { %v714_v0 = vsel %vm600_vm14, %v407_v53, %v657_v60  ;;  %v410_v1 = vadd.f32 %v1613_v35, %v409_v62  ;;  %v744_v2 = vsel %vm630_vm15, %v527_v55, %v687_v61  ;;  %v530_v3 = vadd.f32 %v1613_v35, %v529_v63 }
  0xfe   :  { %v1180_v4 = vpack.c.bf16 %v714_v0, %v714_v0  ;;  %v1284_v5 = vpop.f32.mrf.mxu0  ;;  %v1210_v6 = vpack.c.bf16 %v744_v2, %v744_v2  ;;  %v1344_v7 = vpop.f32.mrf.mxu1 }
  0xff   :  { %vm601_vm0 = vcmp.gt.f32.partialorder %v410_v1, 0.0  ;;  %v658_v8 = vmul.f32 0.01, %v410_v1  ;;  %vm631_vm1 = vcmp.gt.f32.partialorder %v530_v3, 0.0  ;;  %v688_v9 = vmul.f32 0.01, %v530_v3 }
 0x100   :  { %1001 = vst.msk [vmem:[%s1902_s3 + $0x30] sm:$0xf] %vm988_vm6, %v1180_v4  ;;  %1031 = vst.msk [vmem:[%s1902_s3 + $0xa8] sm:$0xf] %vm988_vm6, %v1210_v6  ;;  %v414_v10 = vpop.f32.mrf.mxu0  ;;  %v534_v11 = vpop.f32.mrf.mxu1 }
 0x101   :  { %v715_v12 = vsel %vm601_vm0, %v410_v1, %v658_v8  ;;  %v415_v13 = vadd.f32 %v1613_v35, %v414_v10  ;;  %v745_v14 = vsel %vm631_vm1, %v530_v3, %v688_v9  ;;  %v535_v15 = vadd.f32 %v1613_v35, %v534_v11 }
 0x102   :  { %v1181_v16 = vpack.c.bf16 %v715_v12, %v715_v12  ;;  %v1287_v17 = vpop.f32.mrf.mxu0  ;;  %v1211_v18 = vpack.c.bf16 %v745_v14, %v745_v14  ;;  %v1347_v19 = vpop.f32.mrf.mxu1 }
 0x103   :  { %vm602_vm2 = vcmp.gt.f32.partialorder %v415_v13, 0.0  ;;  %v659_v20 = vmul.f32 0.01, %v415_v13  ;;  %vm632_vm3 = vcmp.gt.f32.partialorder %v535_v15, 0.0  ;;  %v689_v21 = vmul.f32 0.01, %v535_v15 }
 0x104   :  { %1002 = vst.msk [vmem:[%s1902_s3 + $0x34] sm:$0xf] %vm988_vm6, %v1181_v16  ;;  %1032 = vst.msk [vmem:[%s1902_s3 + $0xac] sm:$0xf] %vm988_vm6, %v1211_v18  ;;  %v417_v22 = vpop.f32.mrf.mxu0  ;;  %v537_v23 = vpop.f32.mrf.mxu1 }
 0x105   :  { %v716_v24 = vsel %vm602_vm2, %v415_v13, %v659_v20  ;;  %v418_v25 = vadd.f32 %v1613_v35, %v417_v22  ;;  %v746_v26 = vsel %vm632_vm3, %v535_v15, %v689_v21  ;;  %v538_v27 = vadd.f32 %v1613_v35, %v537_v23 }
 0x106   :  { %v1182_v28 = vpack.c.bf16 %v716_v24, %v716_v24  ;;  %v1288_v29 = vpop.f32.mrf.mxu0  ;;  %v1212_v30 = vpack.c.bf16 %v746_v26, %v746_v26  ;;  %v1348_v31 = vpop.f32.mrf.mxu1 }
 0x107   :  { %vm603_vm4 = vcmp.gt.f32.partialorder %v418_v25, 0.0  ;;  %v660_v32 = vmul.f32 0.01, %v418_v25  ;;  %vm633_vm5 = vcmp.gt.f32.partialorder %v538_v27, 0.0  ;;  %v690_v33 = vmul.f32 0.01, %v538_v27 }
 0x108   :  { %1003 = vst.msk [vmem:[%s1902_s3 + $0x38] sm:$0xf] %vm988_vm6, %v1182_v28  ;;  %1033 = vst.msk [vmem:[%s1902_s3 + $0xb0] sm:$0xf] %vm988_vm6, %v1212_v30  ;;  %v422_v34 = vpop.f32.mrf.mxu0  ;;  %v542_v36 = vpop.f32.mrf.mxu1 }
 0x109   :  { %v717_v37 = vsel %vm603_vm4, %v418_v25, %v660_v32  ;;  %v423_v38 = vadd.f32 %v1613_v35, %v422_v34  ;;  %v747_v39 = vsel %vm633_vm5, %v538_v27, %v690_v33  ;;  %v543_v40 = vadd.f32 %v1613_v35, %v542_v36 }
 0x10a   :  { %v1183_v41 = vpack.c.bf16 %v717_v37, %v717_v37  ;;  %v1291_v42 = vpop.f32.mrf.mxu0  ;;  %v1213_v43 = vpack.c.bf16 %v747_v39, %v747_v39  ;;  %v1351_v44 = vpop.f32.mrf.mxu1 }
 0x10b   :  { %vm604_vm7 = vcmp.gt.f32.partialorder %v423_v38, 0.0  ;;  %v661_v45 = vmul.f32 0.01, %v423_v38  ;;  %vm634_vm8 = vcmp.gt.f32.partialorder %v543_v40, 0.0  ;;  %v691_v46 = vmul.f32 0.01, %v543_v40 }
 0x10c   :  { %1004 = vst.msk [vmem:[%s1902_s3 + $0x3c] sm:$0xf] %vm988_vm6, %v1183_v41  ;;  %1034 = vst.msk [vmem:[%s1902_s3 + $0xb4] sm:$0xf] %vm988_vm6, %v1213_v43  ;;  %v425_v47 = vpop.f32.mrf.mxu0  ;;  %v545_v48 = vpop.f32.mrf.mxu1 }
 0x10d   :  { %v718_v49 = vsel %vm604_vm7, %v423_v38, %v661_v45  ;;  %v426_v50 = vadd.f32 %v1613_v35, %v425_v47  ;;  %v748_v51 = vsel %vm634_vm8, %v543_v40, %v691_v46  ;;  %v546_v52 = vadd.f32 %v1613_v35, %v545_v48 }
 0x10e   :  { %v1184_v53 = vpack.c.bf16 %v718_v49, %v718_v49  ;;  %v1292_v54 = vpop.f32.mrf.mxu0  ;;  %v1214_v55 = vpack.c.bf16 %v748_v51, %v748_v51  ;;  %v1352_v56 = vpop.f32.mrf.mxu1 }
 0x10f   :  { %vm605_vm9 = vcmp.gt.f32.partialorder %v426_v50, 0.0  ;;  %v662_v57 = vmul.f32 0.01, %v426_v50  ;;  %vm635_vm10 = vcmp.gt.f32.partialorder %v546_v52, 0.0  ;;  %v692_v58 = vmul.f32 0.01, %v546_v52 }
 0x110   :  { %1005 = vst.msk [vmem:[%s1902_s3 + $0x40] sm:$0xf] %vm988_vm6, %v1184_v53  ;;  %1035 = vst.msk [vmem:[%s1902_s3 + $0xb8] sm:$0xf] %vm988_vm6, %v1214_v55  ;;  %v430_v59 = vpop.f32.mrf.mxu0  ;;  %v550_v60 = vpop.f32.mrf.mxu1 }
 0x111   :  { %v719_v61 = vsel %vm605_vm9, %v426_v50, %v662_v57  ;;  %v431_v62 = vadd.f32 %v1613_v35, %v430_v59  ;;  %v749_v63 = vsel %vm635_vm10, %v546_v52, %v692_v58  ;;  %v551_v0 = vadd.f32 %v1613_v35, %v550_v60 }
 0x112   :  { %v1185_v1 = vpack.c.bf16 %v719_v61, %v719_v61  ;;  %v1295_v2 = vpop.f32.mrf.mxu0  ;;  %v1215_v3 = vpack.c.bf16 %v749_v63, %v749_v63  ;;  %v1355_v4 = vpop.f32.mrf.mxu1 }
 0x113   :  { %vm606_vm11 = vcmp.gt.f32.partialorder %v431_v62, 0.0  ;;  %v663_v5 = vmul.f32 0.01, %v431_v62  ;;  %vm636_vm12 = vcmp.gt.f32.partialorder %v551_v0, 0.0  ;;  %v693_v6 = vmul.f32 0.01, %v551_v0 }
 0x114   :  { %1006 = vst.msk [vmem:[%s1902_s3 + $0x44] sm:$0xf] %vm988_vm6, %v1185_v1  ;;  %1036 = vst.msk [vmem:[%s1902_s3 + $0xbc] sm:$0xf] %vm988_vm6, %v1215_v3  ;;  %v433_v7 = vpop.f32.mrf.mxu0  ;;  %v553_v8 = vpop.f32.mrf.mxu1 }
 0x115   :  { %v720_v9 = vsel %vm606_vm11, %v431_v62, %v663_v5  ;;  %v434_v10 = vadd.f32 %v1613_v35, %v433_v7  ;;  %v750_v11 = vsel %vm636_vm12, %v551_v0, %v693_v6  ;;  %v554_v12 = vadd.f32 %v1613_v35, %v553_v8 }
 0x116   :  { %v1186_v13 = vpack.c.bf16 %v720_v9, %v720_v9  ;;  %v1296_v14 = vpop.f32.mrf.mxu0  ;;  %v1216_v15 = vpack.c.bf16 %v750_v11, %v750_v11  ;;  %v1356_v16 = vpop.f32.mrf.mxu1 }
 0x117   :  { %vm607_vm13 = vcmp.gt.f32.partialorder %v434_v10, 0.0  ;;  %v664_v17 = vmul.f32 0.01, %v434_v10  ;;  %vm637_vm14 = vcmp.gt.f32.partialorder %v554_v12, 0.0  ;;  %v694_v18 = vmul.f32 0.01, %v554_v12 }
 0x118   :  { %1007 = vst.msk [vmem:[%s1902_s3 + $0x48] sm:$0xf] %vm988_vm6, %v1186_v13  ;;  %1037 = vst.msk [vmem:[%s1902_s3 + $0xc0] sm:$0xf] %vm988_vm6, %v1216_v15  ;;  %v438_v19 = vpop.f32.mrf.mxu0  ;;  %v558_v20 = vpop.f32.mrf.mxu1 }
 0x119   :  { %v721_v21 = vsel %vm607_vm13, %v434_v10, %v664_v17  ;;  %v439_v22 = vadd.f32 %v1613_v35, %v438_v19  ;;  %v751_v23 = vsel %vm637_vm14, %v554_v12, %v694_v18  ;;  %v559_v24 = vadd.f32 %v1613_v35, %v558_v20 }
 0x11a   :  { %v1187_v25 = vpack.c.bf16 %v721_v21, %v721_v21  ;;  %v1299_v26 = vpop.f32.mrf.mxu0  ;;  %v1217_v27 = vpack.c.bf16 %v751_v23, %v751_v23  ;;  %v1359_v28 = vpop.f32.mrf.mxu1  ;;  %vm1045_vm14 = vcmask 253952  }
 0x11b   :  { %vm608_vm15 = vcmp.gt.f32.partialorder %v439_v22, 0.0  ;;  %v665_v29 = vmul.f32 0.01, %v439_v22  ;;  %vm638_vm0 = vcmp.gt.f32.partialorder %v559_v24, 0.0  ;;  %v695_v30 = vmul.f32 0.01, %v559_v24 }
 0x11c   :  { %1008 = vst.msk [vmem:[%s1902_s3 + $0x4c] sm:$0xf] %vm988_vm6, %v1187_v25  ;;  %1038 = vst.msk [vmem:[%s1902_s3 + $0xc4] sm:$0xf] %vm988_vm6, %v1217_v27  ;;  %v441_v31 = vpop.f32.mrf.mxu0  ;;  %v561_v32 = vpop.f32.mrf.mxu1 }
 0x11d   :  { %v722_v33 = vsel %vm608_vm15, %v439_v22, %v665_v29  ;;  %v442_v34 = vadd.f32 %v1613_v35, %v441_v31  ;;  %v752_v36 = vsel %vm638_vm0, %v559_v24, %v695_v30  ;;  %v562_v37 = vadd.f32 %v1613_v35, %v561_v32 }
 0x11e   :  { %v1188_v38 = vpack.c.bf16 %v722_v33, %v722_v33  ;;  %v1300_v39 = vpop.f32.mrf.mxu0  ;;  %v1218_v40 = vpack.c.bf16 %v752_v36, %v752_v36  ;;  %v1360_v41 = vpop.f32.mrf.mxu1 }
 0x11f   :  { %vm609_vm1 = vcmp.gt.f32.partialorder %v442_v34, 0.0  ;;  %v666_v42 = vmul.f32 0.01, %v442_v34  ;;  %vm639_vm2 = vcmp.gt.f32.partialorder %v562_v37, 0.0  ;;  %v696_v43 = vmul.f32 0.01, %v562_v37 }
 0x120   :  { %1009 = vst.msk [vmem:[%s1902_s3 + $0x50] sm:$0xf] %vm988_vm6, %v1188_v38  ;;  %1039 = vst.msk [vmem:[%s1902_s3 + $0xc8] sm:$0xf] %vm988_vm6, %v1218_v40  ;;  %v446_v44 = vpop.f32.mrf.mxu0  ;;  %v566_v45 = vpop.f32.mrf.mxu1 }
 0x121   :  { %v723_v46 = vsel %vm609_vm1, %v442_v34, %v666_v42  ;;  %v447_v47 = vadd.f32 %v1613_v35, %v446_v44  ;;  %v753_v48 = vsel %vm639_vm2, %v562_v37, %v696_v43  ;;  %v567_v49 = vadd.f32 %v1613_v35, %v566_v45 }
 0x122   :  { %v1189_v50 = vpack.c.bf16 %v723_v46, %v723_v46  ;;  %v1303_v51 = vpop.f32.mrf.mxu0  ;;  %v1219_v52 = vpack.c.bf16 %v753_v48, %v753_v48  ;;  %v1363_v53 = vpop.f32.mrf.mxu1 }
 0x123   :  { %vm610_vm3 = vcmp.gt.f32.partialorder %v447_v47, 0.0  ;;  %v667_v54 = vmul.f32 0.01, %v447_v47  ;;  %vm640_vm4 = vcmp.gt.f32.partialorder %v567_v49, 0.0  ;;  %v697_v55 = vmul.f32 0.01, %v567_v49 }
 0x124   :  { %1010 = vst.msk [vmem:[%s1902_s3 + $0x54] sm:$0xf] %vm988_vm6, %v1189_v50  ;;  %1040 = vst.msk [vmem:[%s1902_s3 + $0xcc] sm:$0xf] %vm988_vm6, %v1219_v52  ;;  %v449_v56 = vpop.f32.mrf.mxu0  ;;  %v569_v57 = vpop.f32.mrf.mxu1 }
 0x125   :  { %v724_v58 = vsel %vm610_vm3, %v447_v47, %v667_v54  ;;  %v450_v59 = vadd.f32 %v1613_v35, %v449_v56  ;;  %v754_v60 = vsel %vm640_vm4, %v567_v49, %v697_v55  ;;  %v570_v61 = vadd.f32 %v1613_v35, %v569_v57 }
 0x126   :  { %v1190_v62 = vpack.c.bf16 %v724_v58, %v724_v58  ;;  %v1304_v63 = vpop.f32.mrf.mxu0  ;;  %v1220_v0 = vpack.c.bf16 %v754_v60, %v754_v60  ;;  %v1364_v1 = vpop.f32.mrf.mxu1 }
 0x127   :  { %vm611_vm5 = vcmp.gt.f32.partialorder %v450_v59, 0.0  ;;  %v668_v2 = vmul.f32 0.01, %v450_v59  ;;  %vm641_vm7 = vcmp.gt.f32.partialorder %v570_v61, 0.0  ;;  %v698_v3 = vmul.f32 0.01, %v570_v61 }
 0x128   :  { %1011 = vst.msk [vmem:[%s1902_s3 + $0x58] sm:$0xf] %vm988_vm6, %v1190_v62  ;;  %1041 = vst.msk [vmem:[%s1902_s3 + $0xd0] sm:$0xf] %vm988_vm6, %v1220_v0  ;;  %v454_v4 = vpop.f32.mrf.mxu0  ;;  %v574_v5 = vpop.f32.mrf.mxu1 }
 0x129   :  { %v725_v6 = vsel %vm611_vm5, %v450_v59, %v668_v2  ;;  %v455_v7 = vadd.f32 %v1613_v35, %v454_v4  ;;  %v755_v8 = vsel %vm641_vm7, %v570_v61, %v698_v3  ;;  %v575_v9 = vadd.f32 %v1613_v35, %v574_v5 }
 0x12a   :  { %v1191_v10 = vpack.c.bf16 %v725_v6, %v725_v6  ;;  %v1307_v11 = vpop.f32.mrf.mxu0  ;;  %v1221_v12 = vpack.c.bf16 %v755_v8, %v755_v8  ;;  %v1367_v13 = vpop.f32.mrf.mxu1 }
 0x12b   :  { %vm612_vm8 = vcmp.gt.f32.partialorder %v455_v7, 0.0  ;;  %v669_v14 = vmul.f32 0.01, %v455_v7  ;;  %vm642_vm9 = vcmp.gt.f32.partialorder %v575_v9, 0.0  ;;  %v699_v15 = vmul.f32 0.01, %v575_v9 }
 0x12c   :  { %1012 = vst.msk [vmem:[%s1902_s3 + $0x5c] sm:$0xf] %vm988_vm6, %v1191_v10  ;;  %1042 = vst.msk [vmem:[%s1902_s3 + $0xd4] sm:$0xf] %vm988_vm6, %v1221_v12  ;;  %v457_v16 = vpop.f32.mrf.mxu0  ;;  %v577_v17 = vpop.f32.mrf.mxu1 }
 0x12d   :  { %v726_v18 = vsel %vm612_vm8, %v455_v7, %v669_v14  ;;  %v458_v19 = vadd.f32 %v1613_v35, %v457_v16  ;;  %v756_v20 = vsel %vm642_vm9, %v575_v9, %v699_v15  ;;  %v578_v21 = vadd.f32 %v1613_v35, %v577_v17 }
 0x12e   :  { %v1192_v22 = vpack.c.bf16 %v726_v18, %v726_v18  ;;  %v1308_v23 = vpop.f32.mrf.mxu0  ;;  %v1222_v24 = vpack.c.bf16 %v756_v20, %v756_v20  ;;  %v1368_v25 = vpop.f32.mrf.mxu1 }
 0x12f   :  { %vm613_vm10 = vcmp.gt.f32.partialorder %v458_v19, 0.0  ;;  %v670_v26 = vmul.f32 0.01, %v458_v19  ;;  %vm643_vm11 = vcmp.gt.f32.partialorder %v578_v21, 0.0  ;;  %v700_v27 = vmul.f32 0.01, %v578_v21 }
 0x130   :  { %1013 = vst.msk [vmem:[%s1902_s3 + $0x60] sm:$0xf] %vm988_vm6, %v1192_v22  ;;  %1043 = vst.msk [vmem:[%s1902_s3 + $0xd8] sm:$0xf] %vm988_vm6, %v1222_v24  ;;  %v462_v28 = vpop.f32.mrf.mxu0  ;;  %v582_v29 = vpop.f32.mrf.mxu1 }
 0x131   :  { %v727_v30 = vsel %vm613_vm10, %v458_v19, %v670_v26  ;;  %v463_v31 = vadd.f32 %v1613_v35, %v462_v28  ;;  %v757_v32 = vsel %vm643_vm11, %v578_v21, %v700_v27  ;;  %v583_v33 = vadd.f32 %v1613_v35, %v582_v29 }
 0x132   :  { %v1193_v34 = vpack.c.bf16 %v727_v30, %v727_v30  ;;  %v1311_v36 = vpop.f32.mrf.mxu0  ;;  %v1223_v37 = vpack.c.bf16 %v757_v32, %v757_v32  ;;  %v1371_v38 = vpop.f32.mrf.mxu1 }
 0x133   :  { %vm614_vm12 = vcmp.gt.f32.partialorder %v463_v31, 0.0  ;;  %v671_v39 = vmul.f32 0.01, %v463_v31  ;;  %vm644_vm13 = vcmp.gt.f32.partialorder %v583_v33, 0.0  ;;  %v701_v40 = vmul.f32 0.01, %v583_v33 }
 0x134   :  { %1014 = vst.msk [vmem:[%s1902_s3 + $0x64] sm:$0xf] %vm988_vm6, %v1193_v34  ;;  %1044 = vst.msk [vmem:[%s1902_s3 + $0xdc] sm:$0xf] %vm988_vm6, %v1223_v37  ;;  %v465_v41 = vpop.f32.mrf.mxu0  ;;  %v585_v42 = vpop.f32.mrf.mxu1 }
 0x135   :  { %v728_v43 = vsel %vm614_vm12, %v463_v31, %v671_v39  ;;  %v466_v44 = vadd.f32 %v1613_v35, %v465_v41  ;;  %v758_v45 = vsel %vm644_vm13, %v583_v33, %v701_v40 }
 0x136   :  { %v1194_v46 = vpack.c.bf16 %v728_v43, %v728_v43  ;;  %v1312_v47 = vpop.f32.mrf.mxu0  ;;  %v1224_v48 = vpack.c.bf16 %v758_v45, %v758_v45  ;;  %v1372_v49 = vpop.f32.mrf.mxu1 }
 0x137   :  { %vm615_vm15 = vcmp.gt.f32.partialorder %v466_v44, 0.0  ;;  %v672_v50 = vmul.f32 0.01, %v466_v44 }
 0x138   :  { %1015 = vst.msk [vmem:[%s1902_s3 + $0x68] sm:$0xf] %vm988_vm6, %v1194_v46  ;;  %v470_v51 = vpop.f32.mrf.mxu0 }
 0x139   :  { %1046 = vst.msk [vmem:[%s1902_s3 + $0xe0] sm:$0x1] %vm1045_vm14, %v1224_v48  ;;  %v729_v52 = vsel %vm615_vm15, %v466_v44, %v672_v50  ;;  %v471_v53 = vadd.f32 %v1613_v35, %v470_v51 }
 0x13a   :  { %v1195_v54 = vpack.c.bf16 %v729_v52, %v729_v52  ;;  %v1315_v55 = vpop.f32.mrf.mxu0 }
 0x13b   :  { %vm616_vm0 = vcmp.gt.f32.partialorder %v471_v53, 0.0  ;;  %v673_v56 = vmul.f32 0.01, %v471_v53 }
 0x13c   :  { %1016 = vst.msk [vmem:[%s1902_s3 + $0x6c] sm:$0xf] %vm988_vm6, %v1195_v54  ;;  %v473_v57 = vpop.f32.mrf.mxu0 }
 0x13d   :  { %v730_v58 = vsel %vm616_vm0, %v471_v53, %v673_v56  ;;  %v474_v59 = vadd.f32 %v1613_v35, %v473_v57 }
 0x13e   :  { %v1196_v60 = vpack.c.bf16 %v730_v58, %v730_v58  ;;  %v1316_v61 = vpop.f32.mrf.mxu0 }
 0x13f   :  { %vm617_vm1 = vcmp.gt.f32.partialorder %v474_v59, 0.0  ;;  %v674_v62 = vmul.f32 0.01, %v474_v59 }
 0x140   :  { %1017 = vst.msk [vmem:[%s1902_s3 + $0x70] sm:$0xf] %vm988_vm6, %v1196_v60 }
 0x141   :  { %v731_v63 = vsel %vm617_vm1, %v474_v59, %v674_v62 }
 0x142   :  { %v1197_v0 = vpack.c.bf16 %v731_v63, %v731_v63 }
 0x144   :  { %1018 = vst.msk [vmem:[%s1902_s3 + $0x74] sm:$0xf] %vm988_vm6, %v1197_v0 }

// kernel: calogan_discriminator_forward.6
= control target key start
LH: loop header
LB: loop body
LE: loop exit
PB: predicated region body
PF: predicated region fallthrough
CT: control target
= control target key end

     0   :  { %v820_v1 = vmov 0.0   ;;  %vm821_vm0 = vmmov 0   ;;  %vm292_vm1 = vcmask 261120   ;;  %vm582_vm3 = vcmask 519168   ;;  %s1048_s1 = inlined_call_operand.vmem [shape: bf16[288,64], index: 1, kind: input, shape index: {}]   ;;  %s1049_s0 = inlined_call_operand.vmem [shape: bf16[98,288], index: 0, kind: input, shape index: {}]   ;;  %s1050_s2 = inlined_call_operand.vmem [shape: f32[1,64], index: 2, kind: input, shape index: {}]   ;;  %s1051_s3 = inlined_call_operand.vmem [shape: bf16[98,64], index: 3, kind: output, shape index: {}]  }
   0x1   :  { %v775_v0 = vld [vmem:[%s1048_s1 + $0x78] sm:$0xff]   ;;  %741 = vmatprep.subr.bf16.mxu1 %v820_v1  ;;  %745 = vmatprep.mubr.msk.bf16.mxu1 %vm821_vm0, %v820_v1  ;;  %v777_v3 = vld [vmem:[%s1048_s1 + $0x70] sm:$0xff]   ;;  %v779_v5 = vld [vmem:[%s1048_s1 + $0x68] sm:$0xff]  }
   0x2   :  { %v776_v2 = vld [vmem:[%s1048_s1 + $0x38] sm:$0xff]   ;;  %674 = vmatprep.subr.bf16.mxu0 %v775_v0  ;;  %v778_v4 = vld [vmem:[%s1048_s1 + $0x30] sm:$0xff]   ;;  %v780_v6 = vld [vmem:[%s1048_s1 + $0x28] sm:$0xff]  }
   0x3   :  { %675 = vmatpush3.bf16.msra.mxu0 %v776_v2  ;;  %v781_v7 = vld [vmem:[%s1048_s1 + $0x60] sm:$0xff]   ;;  %v783_v9 = vld [vmem:[%s1048_s1 + $0x58] sm:$0xff]   ;;  %v789_v10 = vld [vmem:[%s1048_s1 + $0x88] sm:$0xff]  }
   0x4   :  { %676 = vmatprep.subr.bf16.mxu0 %v777_v3  ;;  %v782_v8 = vld [vmem:[%s1048_s1 + $0x20] sm:$0xff]   ;;  %v784_v11 = vld [vmem:[%s1048_s1 + $0x18] sm:$0xff]   ;;  %v785_v12 = vld [vmem:[%s1048_s1 + $0x50] sm:$0xff]   ;;  %742 = vmatpush3.bf16.msra.mxu1 %v789_v10 }
   0x5   :  { %v786_v13 = vld [vmem:[%s1048_s1 + $0x10] sm:$0xff]   ;;  %743 = vmatprep.subr.bf16.mxu1 %v820_v1  ;;  %v792_v14 = vld [vmem:[%s1048_s1 + $0x80] sm:$0xff]   ;;  %v787_v15 = vld [vmem:[%s1048_s1 + $0x48] sm:$0xff]  }
   0x6   :  { %v795_v16 = vld [vmem:[%s1049_s0 + $0x4] ss:$12 sps:$4 sm:$0xff]   ;;  %v796_v17 = vld [vmem:[%s1049_s0 + $0x8] ss:$12 sps:$4 sm:$0xff]   ;;  %v800_v21 = vld [vmem:[%s1049_s0 + $0x20] ss:$12 sps:$4 sm:$0xff]  }
   0x7   :  { %677 = vmatpush3.bf16.msra.mxu0 %v778_v4  ;;  %346 = vmatprep.mubr.bf16.mxu0 %v795_v16  ;;  %v788_v18 = vld [vmem:[%s1048_s1 + $0x8] sm:$0xff]   ;;  %v790_v19 = vld [vmem:[%s1048_s1 + $0x40] sm:$0xff]   ;;  %v808_v27 = vld [vmem:[%s1049_s0 + $0x50] ss:$12 sps:$4 sm:$0xff]  }
   0x8   :  { %678 = vmatprep.subr.bf16.mxu0 %v779_v5  ;;  %744 = vmatpush3.bf16.msra.mxu1 %v792_v14  ;;  %v791_v20 = vld [vmem:[%s1048_s1] sm:$0xff]   ;;  %v797_v23 = vld [vmem:[%s1049_s0 + $0x1c] ss:$12 sps:$4 sm:$0xff]   ;;  %v805_v29 = vld [vmem:[%s1049_s0 + $0x4c] ss:$12 sps:$4 sm:$0xff]  }
   0x9   :  { %v793_v22 = vld [vmem:[%s1049_s0] ss:$12 sps:$4 sm:$0xff]   ;;  %v804_v24 = vld [vmem:[%s1049_s0 + $0x38] ss:$12 sps:$4 sm:$0xff]   ;;  %v803_v28 = vld [vmem:[%s1049_s0 + $0x30] ss:$12 sps:$4 sm:$0xff]  }
   0xa   :  { %v799_v25 = vld [vmem:[%s1049_s0 + $0x18] ss:$12 sps:$4 sm:$0xff]   ;;  %v801_v26 = vld [vmem:[%s1049_s0 + $0x34] ss:$12 sps:$4 sm:$0xff]   ;;  %v813_v35 = vld [vmem:[%s1049_s0 + $0x7c] ss:$12 sps:$4 sm:$0xff]  }
   0xb   :  { %679 = vmatpush3.bf16.msra.mxu0 %v780_v6  ;;  %746 = vmatmul.mubr.msk.bf16.vlgmr.msra.gmra.mxu1 %vm292_vm1, %v796_v17  ;;  %v812_v30 = vld [vmem:[%s1049_s0 + $0x68] ss:$12 sps:$4 sm:$0xff]   ;;  %v809_v32 = vld [vmem:[%s1049_s0 + $0x64] ss:$12 sps:$4 sm:$0xff]   ;;  %v816_v33 = vld [vmem:[%s1049_s0 + $0x80] ss:$12 sps:$4 sm:$0xff]  }
   0xc   :  { %680 = vmatprep.subr.bf16.mxu0 %v781_v7  ;;  %749 = vmatprep.mubr.msk.bf16.mxu1 %vm821_vm0, %v820_v1  ;;  %v807_v31 = vld [vmem:[%s1049_s0 + $0x48] ss:$12 sps:$4 sm:$0xff]   ;;  %v811_v34 = vld [vmem:[%s1049_s0 + $0x60] ss:$12 sps:$4 sm:$0xff]   ;;  %v815_v38 = vld [vmem:[%s1049_s0 + $0x78] ss:$12 sps:$4 sm:$0xff]  }
   0xd   :  { %v819_v36 = vld [vmem:[%s1049_s0 + $0x98] ss:$0 sps:$4 sm:$0x11]   ;;  %v39_v37 = vld [vmem:[%s1049_s0 + $0x90] sm:$0x11] }
   0xe   :  { %v621_v39 = vcombine.high %v39_v37, %v39_v37  ;;  %v620_v40 = vcombine.low %v39_v37, %v39_v37  ;;  %v982_v49 = vld [vmem:[%s1050_s2] ss:$0 sm:$0xff] }
   0xf   :  { %681 = vmatpush3.bf16.msra.mxu0 %v782_v8 }
  0x10   :  { %682 = vmatprep.subr.bf16.mxu0 %v783_v9 }
  0x13   :  { %683 = vmatpush3.bf16.msra.mxu0 %v784_v11  ;;  %750 = vmatmul.mubr.msk.bf16.gmra.mxu1 %vm292_vm1, %v800_v21 }
  0x14   :  { %684 = vmatprep.subr.bf16.mxu0 %v785_v12  ;;  %753 = vmatprep.mubr.msk.bf16.mxu1 %vm821_vm0, %v820_v1 }
  0x17   :  { %685 = vmatpush3.bf16.msra.mxu0 %v786_v13 }
  0x18   :  { %686 = vmatprep.subr.bf16.mxu0 %v787_v15 }
  0x1b   :  { %687 = vmatpush3.bf16.msra.mxu0 %v788_v18  ;;  %754 = vmatmul.mubr.msk.bf16.gmra.mxu1 %vm292_vm1, %v804_v24 }
  0x1c   :  { %688 = vmatprep.subr.bf16.mxu0 %v790_v19  ;;  %757 = vmatprep.mubr.msk.bf16.mxu1 %vm821_vm0, %v820_v1 }
  0x1f   :  { %689 = vmatpush3.bf16.msra.mxu0 %v791_v20 }
  0x22   :  { %347 = vmatmul.mubr.bf16.vlgmr.msra.gmra.mxu0 %v793_v22 }
  0x23   :  { %354 = vmatprep.mubr.bf16.mxu0 %v797_v23  ;;  %758 = vmatmul.mubr.msk.bf16.gmra.mxu1 %vm292_vm1, %v808_v27 }
  0x24   :  { %761 = vmatprep.mubr.msk.bf16.mxu1 %vm821_vm0, %v820_v1 }
  0x2a   :  { %355 = vmatmul.mubr.bf16.gmra.mxu0 %v799_v25 }
  0x2b   :  { %362 = vmatprep.mubr.bf16.mxu0 %v801_v26  ;;  %762 = vmatmul.mubr.msk.bf16.gmra.mxu1 %vm292_vm1, %v812_v30 }
  0x2c   :  { %765 = vmatprep.mubr.msk.bf16.mxu1 %vm821_vm0, %v820_v1 }
  0x32   :  { %363 = vmatmul.mubr.bf16.gmra.mxu0 %v803_v28 }
  0x33   :  { %370 = vmatprep.mubr.bf16.mxu0 %v805_v29  ;;  %766 = vmatmul.mubr.msk.bf16.gmra.mxu1 %vm292_vm1, %v816_v33 }
  0x34   :  { %769 = vmatprep.mubr.msk.bf16.mxu1 %vm821_vm0, %v820_v1  ;;  %vm595_vm0 = vcmask 516096  }
  0x3a   :  { %371 = vmatmul.mubr.bf16.gmra.mxu0 %v807_v31 }
  0x3b   :  { %378 = vmatprep.mubr.bf16.mxu0 %v809_v32  ;;  %770 = vmatmul.mubr.msk.bf16.gmra.mxu1 %vm292_vm1, %v819_v36 }
  0x42   :  { %379 = vmatmul.mubr.bf16.gmra.mxu0 %v811_v34 }
  0x43   :  { %386 = vmatprep.mubr.bf16.mxu0 %v813_v35 }
  0x4a   :  { %387 = vmatmul.mubr.bf16.gmra.mxu0 %v815_v38 }
  0x4b   :  { %394 = vmatprep.mubr.bf16.mxu0 %v621_v39 }
  0x52   :  { %395 = vmatmul.mubr.bf16.gmra.mxu0 %v620_v40 }
  0xcb   :  { %v436_v41 = vpop.f32.mrf.mxu1 }
  0xcd   :  { %v747_v42 = vpop.f32.mrf.mxu1 }
  0xcf   :  { %v439_v43 = vpop.f32.mrf.mxu1 }
  0xd1   :  { %v748_v44 = vpop.f32.mrf.mxu1 }
  0xd3   :  { %v444_v45 = vpop.f32.mrf.mxu1 }
  0xd5   :  { %v751_v46 = vpop.f32.mrf.mxu1 }
  0xd7   :  { %v447_v48 = vpop.f32.mrf.mxu1 }
  0xd9   :  { %v752_v52 = vpop.f32.mrf.mxu1 }
  0xdb   :  { %v452_v55 = vpop.f32.mrf.mxu1 }
  0xdd   :  { %v755_v59 = vpop.f32.mrf.mxu1 }
  0xdf   :  { %v455_v63 = vpop.f32.mrf.mxu1 }
  0xe1   :  { %v756_v4 = vpop.f32.mrf.mxu1 }
  0xe2   :  { %v690_v47 = vpop.f32.mrf.mxu0 }
  0xe3   :  { %v460_v9 = vpop.f32.mrf.mxu1 }
  0xe4   :  { %v691_v50 = vpop.f32.mrf.mxu0 }
  0xe5   :  { %v692_v51 = vadd.f32 %v691_v50, %v690_v47  ;;  %v759_v14 = vpop.f32.mrf.mxu1 }
  0xe6   :  { %v693_v53 = vpop.f32.mrf.mxu0 }
  0xe7   :  { %v349_v54 = vadd.f32 %v692_v51, %v982_v49  ;;  %v463_v19 = vpop.f32.mrf.mxu1 }
  0xe8   :  { %v694_v56 = vpop.f32.mrf.mxu0 }
  0xe9   :  { %v437_v57 = vadd.f32 %v436_v41, %v349_v54  ;;  %v695_v58 = vadd.f32 %v694_v56, %v693_v53  ;;  %v760_v24 = vpop.f32.mrf.mxu1 }
  0xea   :  { %v696_v60 = vpop.f32.mrf.mxu0 }
  0xeb   :  { %vm490_vm2 = vcmp.gt.f32.partialorder %v437_v57, 0.0  ;;  %v503_v61 = vmul.f32 0.01, %v437_v57  ;;  %v352_v62 = vadd.f32 %v695_v58, %v982_v49  ;;  %v468_v29 = vpop.f32.mrf.mxu1 }
  0xec   :  { %v697_v0 = vpop.f32.mrf.mxu0 }
  0xed   :  { %v516_v1 = vsel %vm490_vm2, %v437_v57, %v503_v61  ;;  %v440_v2 = vadd.f32 %v439_v43, %v352_v62  ;;  %v698_v3 = vadd.f32 %v697_v0, %v696_v60  ;;  %v763_v34 = vpop.f32.mrf.mxu1 }
  0xee   :  { %v661_v5 = vpack.c.bf16 %v516_v1, %v516_v1  ;;  %v699_v6 = vpop.f32.mrf.mxu0 }
  0xef   :  { %vm491_vm4 = vcmp.gt.f32.partialorder %v440_v2, 0.0  ;;  %v504_v7 = vmul.f32 0.01, %v440_v2  ;;  %v357_v8 = vadd.f32 %v698_v3, %v982_v49  ;;  %v471_v39 = vpop.f32.mrf.mxu1 }
  0xf0   :  { %583 = vst.msk [vmem:[%s1051_s3] sm:$0xf] %vm582_vm3, %v661_v5  ;;  %v700_v10 = vpop.f32.mrf.mxu0 }
  0xf1   :  { %v517_v11 = vsel %vm491_vm4, %v440_v2, %v504_v7  ;;  %v445_v12 = vadd.f32 %v444_v45, %v357_v8  ;;  %v701_v13 = vadd.f32 %v700_v10, %v699_v6  ;;  %v764_v44 = vpop.f32.mrf.mxu1 }
  0xf2   :  { %v662_v15 = vpack.c.bf16 %v517_v11, %v517_v11  ;;  %v702_v16 = vpop.f32.mrf.mxu0 }
  0xf3   :  { %vm492_vm5 = vcmp.gt.f32.partialorder %v445_v12, 0.0  ;;  %v505_v17 = vmul.f32 0.01, %v445_v12  ;;  %v360_v18 = vadd.f32 %v701_v13, %v982_v49  ;;  %v476_v50 = vpop.f32.mrf.mxu1 }
  0xf4   :  { %584 = vst.msk [vmem:[%s1051_s3 + $0x4] sm:$0xf] %vm582_vm3, %v662_v15  ;;  %v703_v20 = vpop.f32.mrf.mxu0 }
  0xf5   :  { %v518_v21 = vsel %vm492_vm5, %v445_v12, %v505_v17  ;;  %v448_v22 = vadd.f32 %v447_v48, %v360_v18  ;;  %v704_v23 = vadd.f32 %v703_v20, %v702_v16 }
  0xf6   :  { %v663_v25 = vpack.c.bf16 %v518_v21, %v518_v21  ;;  %v705_v26 = vpop.f32.mrf.mxu0 }
  0xf7   :  { %vm493_vm6 = vcmp.gt.f32.partialorder %v448_v22, 0.0  ;;  %v506_v27 = vmul.f32 0.01, %v448_v22  ;;  %v365_v28 = vadd.f32 %v704_v23, %v982_v49 }
  0xf8   :  { %585 = vst.msk [vmem:[%s1051_s3 + $0x8] sm:$0xf] %vm582_vm3, %v663_v25  ;;  %v706_v30 = vpop.f32.mrf.mxu0 }
  0xf9   :  { %v519_v31 = vsel %vm493_vm6, %v448_v22, %v506_v27  ;;  %v453_v32 = vadd.f32 %v452_v55, %v365_v28  ;;  %v707_v33 = vadd.f32 %v706_v30, %v705_v26  ;;  %v767_v55 = vpop.f32.mrf.mxu1 }
  0xfa   :  { %v664_v35 = vpack.c.bf16 %v519_v31, %v519_v31  ;;  %v708_v36 = vpop.f32.mrf.mxu0 }
  0xfb   :  { %vm494_vm7 = vcmp.gt.f32.partialorder %v453_v32, 0.0  ;;  %v507_v37 = vmul.f32 0.01, %v453_v32  ;;  %v368_v38 = vadd.f32 %v707_v33, %v982_v49  ;;  %v479_v60 = vpop.f32.mrf.mxu1 }
  0xfc   :  { %586 = vst.msk [vmem:[%s1051_s3 + $0xc] sm:$0xf] %vm582_vm3, %v664_v35  ;;  %v709_v40 = vpop.f32.mrf.mxu0 }
  0xfd   :  { %v520_v41 = vsel %vm494_vm7, %v453_v32, %v507_v37  ;;  %v456_v42 = vadd.f32 %v455_v63, %v368_v38  ;;  %v710_v43 = vadd.f32 %v709_v40, %v708_v36  ;;  %v768_v1 = vpop.f32.mrf.mxu1 }
  0xfe   :  { %v665_v45 = vpack.c.bf16 %v520_v41, %v520_v41  ;;  %v711_v46 = vpop.f32.mrf.mxu0 }
  0xff   :  { %vm495_vm8 = vcmp.gt.f32.partialorder %v456_v42, 0.0  ;;  %v508_v47 = vmul.f32 0.01, %v456_v42  ;;  %v373_v48 = vadd.f32 %v710_v43, %v982_v49  ;;  %v484_v6 = vpop.f32.mrf.mxu1 }
 0x100   :  { %587 = vst.msk [vmem:[%s1051_s3 + $0x10] sm:$0xf] %vm582_vm3, %v665_v45  ;;  %v712_v51 = vpop.f32.mrf.mxu0 }
 0x101   :  { %v521_v52 = vsel %vm495_vm8, %v456_v42, %v508_v47  ;;  %v461_v53 = vadd.f32 %v460_v9, %v373_v48  ;;  %v713_v54 = vadd.f32 %v712_v51, %v711_v46  ;;  %v771_v11 = vpop.f32.mrf.mxu1 }
 0x102   :  { %v666_v56 = vpack.c.bf16 %v521_v52, %v521_v52  ;;  %v714_v57 = vpop.f32.mrf.mxu0 }
 0x103   :  { %vm496_vm9 = vcmp.gt.f32.partialorder %v461_v53, 0.0  ;;  %v509_v58 = vmul.f32 0.01, %v461_v53  ;;  %v376_v59 = vadd.f32 %v713_v54, %v982_v49  ;;  %v487_v16 = vpop.f32.mrf.mxu1 }
 0x104   :  { %588 = vst.msk [vmem:[%s1051_s3 + $0x14] sm:$0xf] %vm582_vm3, %v666_v56  ;;  %v715_v61 = vpop.f32.mrf.mxu0 }
 0x105   :  { %v522_v62 = vsel %vm496_vm9, %v461_v53, %v509_v58  ;;  %v464_v63 = vadd.f32 %v463_v19, %v376_v59  ;;  %v716_v0 = vadd.f32 %v715_v61, %v714_v57  ;;  %v772_v21 = vpop.f32.mrf.mxu1 }
 0x106   :  { %v667_v2 = vpack.c.bf16 %v522_v62, %v522_v62  ;;  %v717_v3 = vpop.f32.mrf.mxu0 }
 0x107   :  { %vm497_vm10 = vcmp.gt.f32.partialorder %v464_v63, 0.0  ;;  %v510_v4 = vmul.f32 0.01, %v464_v63  ;;  %v381_v5 = vadd.f32 %v716_v0, %v982_v49 }
 0x108   :  { %589 = vst.msk [vmem:[%s1051_s3 + $0x18] sm:$0xf] %vm582_vm3, %v667_v2  ;;  %v718_v7 = vpop.f32.mrf.mxu0 }
 0x109   :  { %v523_v8 = vsel %vm497_vm10, %v464_v63, %v510_v4  ;;  %v469_v9 = vadd.f32 %v468_v29, %v381_v5  ;;  %v719_v10 = vadd.f32 %v718_v7, %v717_v3 }
 0x10a   :  { %v668_v12 = vpack.c.bf16 %v523_v8, %v523_v8  ;;  %v720_v13 = vpop.f32.mrf.mxu0 }
 0x10b   :  { %vm498_vm11 = vcmp.gt.f32.partialorder %v469_v9, 0.0  ;;  %v511_v14 = vmul.f32 0.01, %v469_v9  ;;  %v384_v15 = vadd.f32 %v719_v10, %v982_v49 }
 0x10c   :  { %590 = vst.msk [vmem:[%s1051_s3 + $0x1c] sm:$0xf] %vm582_vm3, %v668_v12  ;;  %v721_v17 = vpop.f32.mrf.mxu0 }
 0x10d   :  { %v524_v18 = vsel %vm498_vm11, %v469_v9, %v511_v14  ;;  %v472_v19 = vadd.f32 %v471_v39, %v384_v15  ;;  %v722_v20 = vadd.f32 %v721_v17, %v720_v13 }
 0x10e   :  { %v669_v22 = vpack.c.bf16 %v524_v18, %v524_v18  ;;  %v723_v23 = vpop.f32.mrf.mxu0 }
 0x10f   :  { %vm499_vm12 = vcmp.gt.f32.partialorder %v472_v19, 0.0  ;;  %v512_v24 = vmul.f32 0.01, %v472_v19  ;;  %v389_v25 = vadd.f32 %v722_v20, %v982_v49 }
 0x110   :  { %591 = vst.msk [vmem:[%s1051_s3 + $0x20] sm:$0xf] %vm582_vm3, %v669_v22  ;;  %v724_v26 = vpop.f32.mrf.mxu0 }
 0x111   :  { %v525_v27 = vsel %vm499_vm12, %v472_v19, %v512_v24  ;;  %v477_v28 = vadd.f32 %v476_v50, %v389_v25  ;;  %v725_v29 = vadd.f32 %v724_v26, %v723_v23 }
 0x112   :  { %v670_v30 = vpack.c.bf16 %v525_v27, %v525_v27  ;;  %v726_v31 = vpop.f32.mrf.mxu0 }
 0x113   :  { %vm500_vm13 = vcmp.gt.f32.partialorder %v477_v28, 0.0  ;;  %v513_v32 = vmul.f32 0.01, %v477_v28  ;;  %v392_v33 = vadd.f32 %v725_v29, %v982_v49 }
 0x114   :  { %592 = vst.msk [vmem:[%s1051_s3 + $0x24] sm:$0xf] %vm582_vm3, %v670_v30  ;;  %v727_v34 = vpop.f32.mrf.mxu0 }
 0x115   :  { %v526_v35 = vsel %vm500_vm13, %v477_v28, %v513_v32  ;;  %v480_v36 = vadd.f32 %v479_v60, %v392_v33  ;;  %v728_v37 = vadd.f32 %v727_v34, %v726_v31 }
 0x116   :  { %v671_v38 = vpack.c.bf16 %v526_v35, %v526_v35  ;;  %v729_v39 = vpop.f32.mrf.mxu0 }
 0x117   :  { %vm501_vm14 = vcmp.gt.f32.partialorder %v480_v36, 0.0  ;;  %v514_v40 = vmul.f32 0.01, %v480_v36  ;;  %v397_v41 = vadd.f32 %v728_v37, %v982_v49 }
 0x118   :  { %593 = vst.msk [vmem:[%s1051_s3 + $0x28] sm:$0xf] %vm582_vm3, %v671_v38  ;;  %v730_v42 = vpop.f32.mrf.mxu0 }
 0x119   :  { %v527_v43 = vsel %vm501_vm14, %v480_v36, %v514_v40  ;;  %v485_v44 = vadd.f32 %v484_v6, %v397_v41 }
 0x11a   :  { %v672_v45 = vpack.c.bf16 %v527_v43, %v527_v43 }
 0x11b   :  { %vm502_vm15 = vcmp.gt.f32.partialorder %v485_v44, 0.0  ;;  %v515_v46 = vmul.f32 0.01, %v485_v44 }
 0x11c   :  { %594 = vst.msk [vmem:[%s1051_s3 + $0x2c] sm:$0xf] %vm582_vm3, %v672_v45 }
 0x11d   :  { %v528_v47 = vsel %vm502_vm15, %v485_v44, %v515_v46 }
 0x11e   :  { %v673_v48 = vpack.c.bf16 %v528_v47, %v528_v47 }
 0x120   :  { %596 = vst.msk [vmem:[%s1051_s3 + $0x30] sm:$0x1] %vm595_vm0, %v673_v48 }

// kernel: calogan_discriminator_forward.7
= control target key start
LH: loop header
LB: loop body
LE: loop exit
PB: predicated region body
PF: predicated region fallthrough
CT: control target
= control target key end

     0   :  { %vm361_vm0 = vcmask 523264   ;;  %s884_s1 = inlined_call_operand.vmem [shape: bf16[576,128], index: 1, kind: input, shape index: {}]   ;;  %s885_s0 = inlined_call_operand.vmem [shape: bf16[18,576], index: 0, kind: input, shape index: {}]   ;;  %s886_s2 = inlined_call_operand.vmem [shape: f32[1,128], index: 2, kind: input, shape index: {}]   ;;  %s887_s3 = inlined_call_operand.vmem [shape: bf16[18,128], index: 3, kind: output, shape index: {}]  }
   0x1   :  { %v675_v0 = vld [vmem:[%s884_s1 + $0x78] sm:$0xff]   ;;  %v679_v4 = vld [vmem:[%s884_s1 + $0x70] sm:$0xff]   ;;  %v683_v8 = vld [vmem:[%s884_s1 + $0x68] sm:$0xff]  }
   0x2   :  { %v676_v1 = vld [vmem:[%s884_s1 + $0x38] sm:$0xff]   ;;  %601 = vmatprep.subr.bf16.mxu0 %v675_v0  ;;  %v680_v5 = vld [vmem:[%s884_s1 + $0x30] sm:$0xff]   ;;  %v684_v9 = vld [vmem:[%s884_s1 + $0x28] sm:$0xff]  }
   0x3   :  { %v677_v2 = vld [vmem:[%s884_s1 + $0xf8] sm:$0xff]   ;;  %602 = vmatpush3.bf16.msra.mxu0 %v676_v1  ;;  %v681_v6 = vld [vmem:[%s884_s1 + $0xf0] sm:$0xff]   ;;  %v685_v10 = vld [vmem:[%s884_s1 + $0xe8] sm:$0xff]  }
   0x4   :  { %v678_v3 = vld [vmem:[%s884_s1 + $0xb8] sm:$0xff]   ;;  %629 = vmatprep.subr.bf16.mxu1 %v677_v2  ;;  %603 = vmatprep.subr.bf16.mxu0 %v679_v4  ;;  %v682_v7 = vld [vmem:[%s884_s1 + $0xb0] sm:$0xff]   ;;  %v686_v11 = vld [vmem:[%s884_s1 + $0xa8] sm:$0xff]  }
   0x5   :  { %630 = vmatpush3.bf16.msra.mxu1 %v678_v3  ;;  %v687_v12 = vld [vmem:[%s884_s1 + $0x60] sm:$0xff]   ;;  %v691_v16 = vld [vmem:[%s884_s1 + $0x58] sm:$0xff]   ;;  %v695_v20 = vld [vmem:[%s884_s1 + $0x50] sm:$0xff]  }
   0x6   :  { %631 = vmatprep.subr.bf16.mxu1 %v681_v6  ;;  %v688_v13 = vld [vmem:[%s884_s1 + $0x20] sm:$0xff]   ;;  %v692_v17 = vld [vmem:[%s884_s1 + $0x18] sm:$0xff]   ;;  %v696_v21 = vld [vmem:[%s884_s1 + $0x10] sm:$0xff]  }
   0x7   :  { %604 = vmatpush3.bf16.msra.mxu0 %v680_v5  ;;  %v689_v14 = vld [vmem:[%s884_s1 + $0xe0] sm:$0xff]   ;;  %v693_v18 = vld [vmem:[%s884_s1 + $0xd8] sm:$0xff]   ;;  %v697_v22 = vld [vmem:[%s884_s1 + $0xd0] sm:$0xff]  }
   0x8   :  { %605 = vmatprep.subr.bf16.mxu0 %v683_v8  ;;  %v690_v15 = vld [vmem:[%s884_s1 + $0xa0] sm:$0xff]   ;;  %v694_v19 = vld [vmem:[%s884_s1 + $0x98] sm:$0xff]   ;;  %v698_v23 = vld [vmem:[%s884_s1 + $0x90] sm:$0xff]  }
   0x9   :  { %632 = vmatpush3.bf16.msra.mxu1 %v682_v7  ;;  %v699_v24 = vld [vmem:[%s884_s1 + $0x48] sm:$0xff]   ;;  %v703_v28 = vld [vmem:[%s884_s1 + $0x40] sm:$0xff]   ;;  %v710_v34 = vld [vmem:[%s884_s1 + $0x118] sm:$0xff]  }
   0xa   :  { %633 = vmatprep.subr.bf16.mxu1 %v685_v10  ;;  %v700_v25 = vld [vmem:[%s884_s1 + $0x8] sm:$0xff]   ;;  %v704_v29 = vld [vmem:[%s884_s1] sm:$0xff]   ;;  %v714_v37 = vld [vmem:[%s884_s1 + $0x110] sm:$0xff]  }
   0xb   :  { %606 = vmatpush3.bf16.msra.mxu0 %v684_v9  ;;  %v701_v26 = vld [vmem:[%s884_s1 + $0xc8] sm:$0xff]   ;;  %v705_v30 = vld [vmem:[%s884_s1 + $0xc0] sm:$0xff]   ;;  %v22_v41 = vld [vmem:[%s885_s0 + $0x30] sm:$0x11] }
   0xc   :  { %607 = vmatprep.subr.bf16.mxu0 %v687_v12  ;;  %v702_v27 = vld [vmem:[%s884_s1 + $0x88] sm:$0xff]   ;;  %v706_v31 = vld [vmem:[%s885_s0] ss:$20 sps:$4 sm:$0xff]   ;;  %v708_v32 = vld [vmem:[%s885_s0 + $0x4] ss:$20 sps:$4 sm:$0xff]   ;;  %v550_v43 = vcombine.high %v22_v41, %v22_v41  ;;  %v549_v45 = vcombine.low %v22_v41, %v22_v41 }
   0xd   :  { %634 = vmatpush3.bf16.msra.mxu1 %v686_v11  ;;  %v709_v33 = vld [vmem:[%s884_s1 + $0x80] sm:$0xff]   ;;  %400 = vmatprep.mubr.bf16.mxu0 %v708_v32  ;;  %v711_v35 = vld [vmem:[%s885_s0 + $0x8] ss:$20 sps:$4 sm:$0xff]   ;;  %v722_v47 = vld [vmem:[%s885_s0 + $0x38] ss:$0 sps:$4 sm:$0x11]  }
   0xe   :  { %635 = vmatprep.subr.bf16.mxu1 %v689_v14  ;;  %v713_v36 = vld [vmem:[%s885_s0 + $0xc] ss:$20 sps:$4 sm:$0xff]   ;;  %v721_v44 = vld [vmem:[%s885_s0 + $0x10] ss:$20 sps:$4 sm:$0xff]  }
   0xf   :  { %608 = vmatpush3.bf16.msra.mxu0 %v688_v13  ;;  %v21_v38 = vld [vmem:[%s885_s0 + $0x28] sm:$0x11]  ;;  %448 = vmatprep.mubr.bf16.mxu1 %v713_v36  ;;  %v720_v46 = vld [vmem:[%s884_s1 + $0x100] sm:$0xff]  }
  0x10   :  { %609 = vmatprep.subr.bf16.mxu0 %v691_v16  ;;  %v548_v39 = vcombine.high %v21_v38, %v21_v38  ;;  %v717_v40 = vld [vmem:[%s884_s1 + $0x108] sm:$0xff]   ;;  %v547_v42 = vcombine.low %v21_v38, %v21_v38  ;;  %v541_v59 = vld [vmem:[%s886_s2] ss:$0 sm:$0xff] }
  0x11   :  { %636 = vmatpush3.bf16.msra.mxu1 %v690_v15 }
  0x12   :  { %637 = vmatprep.subr.bf16.mxu1 %v693_v18 }
  0x13   :  { %610 = vmatpush3.bf16.msra.mxu0 %v692_v17 }
  0x14   :  { %611 = vmatprep.subr.bf16.mxu0 %v695_v20 }
  0x15   :  { %638 = vmatpush3.bf16.msra.mxu1 %v694_v19 }
  0x16   :  { %639 = vmatprep.subr.bf16.mxu1 %v697_v22 }
  0x17   :  { %612 = vmatpush3.bf16.msra.mxu0 %v696_v21 }
  0x18   :  { %613 = vmatprep.subr.bf16.mxu0 %v699_v24 }
  0x19   :  { %640 = vmatpush3.bf16.msra.mxu1 %v698_v23 }
  0x1a   :  { %641 = vmatprep.subr.bf16.mxu1 %v701_v26 }
  0x1b   :  { %614 = vmatpush3.bf16.msra.mxu0 %v700_v25 }
  0x1c   :  { %615 = vmatprep.subr.bf16.mxu0 %v703_v28 }
  0x1d   :  { %642 = vmatpush3.bf16.msra.mxu1 %v702_v27 }
  0x1e   :  { %643 = vmatprep.subr.bf16.mxu1 %v705_v30 }
  0x1f   :  { %616 = vmatpush3.bf16.msra.mxu0 %v704_v29 }
  0x20   :  { %663 = vmatprep.subr.bf16.mxu0 %v710_v34 }
  0x21   :  { %644 = vmatpush3.bf16.msra.mxu1 %v709_v33 }
  0x22   :  { %401 = vmatmul.mubr.bf16.vlgmr.msra.gmra.mxu0 %v706_v31 }
  0x23   :  { %664 = vmatpush3.bf16.msra.mxu0 %v710_v34  ;;  %408 = vmatprep.mubr.bf16.mxu0 %v548_v39 }
  0x24   :  { %449 = vmatmul.mubr.bf16.vlgmr.msra.gmra.mxu1 %v711_v35  ;;  %665 = vmatprep.subr.bf16.mxu0 %v714_v37 }
  0x25   :  { %456 = vmatprep.mubr.bf16.mxu1 %v550_v43 }
  0x27   :  { %666 = vmatpush3.bf16.msra.mxu0 %v714_v37 }
  0x28   :  { %667 = vmatprep.subr.bf16.mxu0 %v717_v40 }
  0x2a   :  { %409 = vmatmul.mubr.bf16.gmra.mxu0 %v547_v42 }
  0x2b   :  { %671 = vmatprep.mubr.msk.bf16.mxu0 %vm361_vm0, %v721_v44  ;;  %668 = vmatpush3.bf16.msra.mxu0 %v717_v40 }
  0x2c   :  { %457 = vmatmul.mubr.bf16.gmra.mxu1 %v549_v45  ;;  %669 = vmatprep.subr.bf16.mxu0 %v720_v46 }
  0x2f   :  { %670 = vmatpush3.bf16.msra.mxu0 %v720_v46 }
  0x32   :  { %672 = vmatmul.mubr.msk.bf16.vlgmr.msra.gmra.mxu0 %vm361_vm0, %v722_v47 }
  0xe2   :  { %v617_v48 = vpop.f32.mrf.mxu0 }
  0xe4   :  { %v618_v49 = vpop.f32.mrf.mxu0  ;;  %v645_v50 = vpop.f32.mrf.mxu1 }
  0xe5   :  { %v619_v57 = vadd.f32 %v618_v49, %v617_v48 }
  0xe6   :  { %v620_v51 = vpop.f32.mrf.mxu0  ;;  %v646_v52 = vpop.f32.mrf.mxu1 }
  0xe7   :  { %v403_v1 = vadd.f32 %v619_v57, %v541_v59  ;;  %v647_v2 = vadd.f32 %v646_v52, %v645_v50 }
  0xe8   :  { %v621_v53 = vpop.f32.mrf.mxu0  ;;  %v648_v54 = vpop.f32.mrf.mxu1 }
  0xe9   :  { %v622_v3 = vadd.f32 %v621_v53, %v620_v51  ;;  %v451_v13 = vadd.f32 %v647_v2, %v403_v1 }
  0xea   :  { %v623_v55 = vpop.f32.mrf.mxu0  ;;  %v649_v56 = vpop.f32.mrf.mxu1 }
  0xeb   :  { %v406_v10 = vadd.f32 %v622_v3, %v541_v59  ;;  %v650_v11 = vadd.f32 %v649_v56, %v648_v54 }
  0xec   :  { %v624_v58 = vpop.f32.mrf.mxu0  ;;  %v651_v61 = vpop.f32.mrf.mxu1 }
  0xed   :  { %v625_v60 = vadd.f32 %v624_v58, %v623_v55  ;;  %v454_v19 = vadd.f32 %v650_v11, %v406_v10 }
  0xee   :  { %v626_v62 = vpop.f32.mrf.mxu0  ;;  %v652_v0 = vpop.f32.mrf.mxu1 }
  0xef   :  { %v411_v63 = vadd.f32 %v625_v60, %v541_v59  ;;  %v653_v4 = vadd.f32 %v652_v0, %v651_v61 }
  0xf0   :  { %v627_v5 = vpop.f32.mrf.mxu0  ;;  %v654_v6 = vpop.f32.mrf.mxu1 }
  0xf1   :  { %v459_v7 = vadd.f32 %v653_v4, %v411_v63 }
  0xf2   :  { %v673_v8 = vpop.f32.mrf.mxu0  ;;  %v655_v9 = vpop.f32.mrf.mxu1 }
  0xf3   :  { %v507_v12 = vadd.f32 %v673_v8, %v459_v7 }
  0xf4   :  { %v498_v14 = vpop.f32.mrf.mxu0 }
  0xf5   :  { %vm514_vm1 = vcmp.gt.f32.partialorder %v507_v12, 0.0  ;;  %v517_v15 = vmul.f32 0.01, %v507_v12  ;;  %v499_v16 = vadd.f32 %v498_v14, %v451_v13 }
  0xf6   :  { %v674_v17 = vpop.f32.mrf.mxu0 }
  0xf7   :  { %v520_v18 = vsel %vm514_vm1, %v507_v12, %v517_v15  ;;  %v515_v22 = vmul.f32 0.01, %v499_v16  ;;  %vm512_vm2 = vcmp.gt.f32.partialorder %v499_v16, 0.0 }
  0xf8   :  { %v595_v20 = vpack.c.bf16 %v520_v18, %v520_v18  ;;  %v501_v21 = vpop.f32.mrf.mxu0 }
  0xf9   :  { %v502_v23 = vadd.f32 %v501_v21, %v454_v19  ;;  %v518_v25 = vsel %vm512_vm2, %v499_v16, %v515_v22 }
  0xfa   :  { %536 = vst [vmem:[%s887_s3 + $0x8] sm:$0x1] %v595_v20 }
  0xfb   :  { %vm513_vm3 = vcmp.gt.f32.partialorder %v502_v23, 0.0  ;;  %v516_v24 = vmul.f32 0.01, %v502_v23 }
  0xfd   :  { %v519_v26 = vsel %vm513_vm3, %v502_v23, %v516_v24 }
  0xfe   :  { %v599_v27 = vpack.c.bf16 %v519_v26, %v518_v25 }
 0x100   :  { %600 = vst [vmem:[%s887_s3] sm:$0xff] %v599_v27  }

// kernel: calogan_discriminator_forward.9
= control target key start
LH: loop header
LB: loop body
LE: loop exit
PB: predicated region body
PF: predicated region fallthrough
CT: control target
= control target key end

     0   :  { %v500_v1 = vmov 0.0   ;;  %vm501_vm0 = vmmov 0   ;;  %vm74_vm1 = vcmask 1043456   ;;  %v130_v10 = vlaneseq  ;;  %s646_s2 = inlined_call_operand.vmem [shape: bf16[256,64], index: 2, kind: input, shape index: {}]   ;;  %s647_s3 = inlined_call_operand.vmem [shape: bf16[8,64], index: 3, kind: input, shape index: {}]   ;;  %s648_s1 = inlined_call_operand.vmem [shape: bf16[2,8], index: 1, kind: input, shape index: {}]   ;;  %s649_s0 = inlined_call_operand.vmem [shape: bf16[2,256], index: 0, kind: input, shape index: {}]   ;;  %s650_s5 = inlined_call_operand.vmem [shape: bf16[64,32], index: 5, kind: input, shape index: {}]   ;;  %s651_s4 = inlined_call_operand.vmem [shape: f32[1,64], index: 4, kind: input, shape index: {}]   ;;  %s652_s8 = inlined_call_operand.<no memory space> [shape: f32[1,1], index: 8, kind: input, shape index: {}]   ;;  %s653_s6 = inlined_call_operand.vmem [shape: f32[1,32], index: 6, kind: input, shape index: {}]   ;;  %s654_s7 = inlined_call_operand.vmem [shape: f32[1,32], index: 7, kind: input, shape index: {}]   ;;  %s655_s9 = inlined_call_operand.vmem [shape: f32[2,1], index: 9, kind: output, shape index: {}]  }
   0x1   :  { %v480_v0 = vld [vmem:[%s646_s2 + $0x78] sm:$0xff]   ;;  %459 = vmatprep.subr.bf16.mxu0 %v500_v1  ;;  %461 = vmatprep.mubr.msk.bf16.mxu0 %vm501_vm0, %v500_v1  ;;  %v482_v3 = vld [vmem:[%s646_s2 + $0x70] sm:$0xff]   ;;  %v484_v5 = vld [vmem:[%s646_s2 + $0x68] sm:$0xff]   ;;  %vm70_vm2 = vcmask 64512   ;;  %v502_v17 = vmov 1966171168   ;;  %v14_v49 = vstv %s652_s8 }
   0x2   :  { %v481_v2 = vld [vmem:[%s646_s2 + $0x38] sm:$0xff]   ;;  %432 = vmatprep.subr.bf16.mxu1 %v480_v0  ;;  %v483_v4 = vld [vmem:[%s646_s2 + $0x30] sm:$0xff]   ;;  %v485_v6 = vld [vmem:[%s646_s2 + $0x28] sm:$0xff]   ;;  %v128_v18 = vunpack.c.l.s4 %v502_v17  ;;  %v131_v19 = vshrl.u32 %v130_v10, 7  ;;  %vm330_vm4 = vcmask 523264   ;;  %vm385_vm6 = vcmask 254976  }
   0x3   :  { %433 = vmatpush3.bf16.msra.mxu1 %v481_v2  ;;  %v486_v7 = vld [vmem:[%s646_s2 + $0x60] sm:$0xff]   ;;  %v488_v9 = vld [vmem:[%s646_s2 + $0x58] sm:$0xff]   ;;  %v490_v14 = vld [vmem:[%s646_s2 + $0x50] sm:$0xff]   ;;  %15 = vst [vmem:[#allocation2] sm:$0x1] %v14_v49  ;;  %vm397_vm7 = vcmask 1024  }
   0x4   :  { %434 = vmatprep.subr.bf16.mxu1 %v482_v3  ;;  %v487_v8 = vld [vmem:[%s646_s2 + $0x20] sm:$0xff]   ;;  %v489_v12 = vld [vmem:[%s646_s2 + $0x18] sm:$0xff]   ;;  %v491_v20 = vld [vmem:[%s646_s2 + $0x10] sm:$0xff]   ;;  %v129_v22 = vunpack.c.0.s8 %v128_v18 }
   0x5   :  { %v69_v11 = vld [vmem:[%s647_s3] sm:$0xf]  ;;  %v492_v23 = vld [vmem:[%s646_s2 + $0x48] sm:$0xff]   ;;  %v496_v30 = vld [vmem:[%s650_s5 + $0x18] sm:$0xff]  }
   0x6   :  { %v76_v13 = vsel %vm74_vm1, %v69_v11, 0  ;;  %v68_v15 = vld [vmem:[%s648_s1] sm:$0x1]  ;;  %v132_v24 = vsub.s32 %v129_v22, %v131_v19  ;;  %v493_v25 = vld [vmem:[%s646_s2 + $0x8] sm:$0xff]   ;;  %v497_v31 = vld [vmem:[%s650_s5 + $0x10] sm:$0xff]  }
   0x7   :  { %435 = vmatpush3.bf16.msra.mxu1 %v483_v4  ;;  %460 = vmatpush3.bf16.msra.mxu0 %v76_v13  ;;  %v404_v16 = vld.sshfl [vmem:[%s649_s0] sm:$0x11 pattern:$0x75316420]  ;;  %v498_v32 = vld [vmem:[%s650_s5 + $0x8] sm:$0xff]  }
   0x8   :  { %436 = vmatprep.subr.bf16.mxu1 %v484_v5  ;;  %465 = vmatprep.subr.bf16.mxu0 %v500_v1  ;;  %v126_v21 = vcombine.high %v404_v16, %v404_v16  ;;  %v494_v27 = vld [vmem:[%s646_s2 + $0x40] sm:$0xff]   ;;  %v133_v29 = vrot.slane %v404_v16, %v132_v24 }
   0x9   :  { %v495_v28 = vld [vmem:[%s646_s2] sm:$0xff]  }
   0xa   :  { %462 = vmatmul.mubr.msk.bf16.vlgmr.msra.gmra.mxu0 %vm70_vm2, %v68_v15  ;;  %v140_v26 = vrot.slane %v126_v21, %v132_v24  ;;  %v499_v33 = vld [vmem:[%s650_s5] sm:$0xff]  }
   0xb   :  { %437 = vmatpush3.bf16.msra.mxu1 %v485_v6  ;;  %473 = vmatprep.mubr.msk.bf16.mxu0 %vm501_vm0, %v500_v1  ;;  %v421_v41 = vld [vmem:[%s651_s4] ss:$0 sm:$0xff] }
   0xc   :  { %438 = vmatprep.subr.bf16.mxu1 %v486_v7  ;;  %271 = vmatprep.mubr.bf16.mxu1 %v140_v26  ;;  %v422_v50 = vld [vmem:[%s653_s6] ss:$0 sm:$0xff] }
   0xd   :  { %466 = vmatpush3.bf16.msra.mxu0 %v496_v30  ;;  %v428_v55 = vld [vmem:[%s654_s7] ss:$0 sm:$0xff] }
   0xe   :  { %467 = vmatprep.subr.bf16.mxu0 %v500_v1  ;;  %v429_v61 = vld [vmem:[#allocation2] ss:$0 sm:$0xff] }
   0xf   :  { %439 = vmatpush3.bf16.msra.mxu1 %v487_v8 }
  0x10   :  { %440 = vmatprep.subr.bf16.mxu1 %v488_v9 }
  0x11   :  { %468 = vmatpush3.bf16.msra.mxu0 %v497_v31 }
  0x12   :  { %469 = vmatprep.subr.bf16.mxu0 %v500_v1 }
  0x13   :  { %441 = vmatpush3.bf16.msra.mxu1 %v489_v12 }
  0x14   :  { %442 = vmatprep.subr.bf16.mxu1 %v490_v14 }
  0x15   :  { %470 = vmatpush3.bf16.msra.mxu0 %v498_v32 }
  0x16   :  { %471 = vmatprep.subr.bf16.mxu0 %v500_v1 }
  0x17   :  { %443 = vmatpush3.bf16.msra.mxu1 %v491_v20 }
  0x18   :  { %444 = vmatprep.subr.bf16.mxu1 %v492_v23 }
  0x19   :  { %472 = vmatpush3.bf16.msra.mxu0 %v499_v33 }
  0x1b   :  { %445 = vmatpush3.bf16.msra.mxu1 %v493_v25 }
  0x1c   :  { %446 = vmatprep.subr.bf16.mxu1 %v494_v27 }
  0x1f   :  { %447 = vmatpush3.bf16.msra.mxu1 %v495_v28 }
  0x22   :  { %272 = vmatmul.mubr.bf16.vlgmr.msra.gmra.mxu1 %v133_v29 }
  0xca   :  { %v112_v34 = vpop.f32.mrf.mxu0 }
  0xcc   :  { %v463_v35 = vpop.f32.mrf.mxu0 }
  0xce   :  { %v115_v36 = vpop.f32.mrf.mxu0 }
  0xd0   :  { %v464_v37 = vpop.f32.mrf.mxu0 }
  0xe2   :  { %v448_v38 = vpop.f32.mrf.mxu1 }
  0xe4   :  { %v449_v39 = vpop.f32.mrf.mxu1 }
  0xe5   :  { %v450_v40 = vadd.f32 %v449_v39, %v448_v38 }
  0xe6   :  { %v451_v42 = vpop.f32.mrf.mxu1 }
  0xe7   :  { %v274_v43 = vadd.f32 %v450_v40, %v112_v34 }
  0xe8   :  { %v452_v44 = vpop.f32.mrf.mxu1 }
  0xe9   :  { %v286_v45 = vadd.f32 %v421_v41, %v274_v43 }
  0xeb   :  { %vm287_vm3 = vcmp.gt.f32.partialorder %v286_v45, 0.0  ;;  %v288_v46 = vmul.f32 0.01, %v286_v45 }
  0xed   :  { %v289_v47 = vsel %vm287_vm3, %v286_v45, %v288_v46 }
  0xee   :  { %v290_v48 = vpack.c.bf16 %v289_v47, %v289_v47 }
  0xf0   :  { %474 = vmatmul.mubr.msk.bf16.vlgmr.msra.gmra.mxu0 %vm330_vm4, %v290_v48 }
 0x1b0   :  { %v368_v51 = vpop.f32.mrf.mxu0 }
 0x1b1   :  { %v369_v52 = vadd.f32 %v422_v50, %v368_v51 }
 0x1b2   :  { %v475_v53 = vpop.f32.mrf.mxu0 }
 0x1b3   :  { %v375_v54 = vmul.f32 0.01, %v369_v52  ;;  %vm374_vm5 = vcmp.gt.f32.partialorder %v369_v52, 0.0 }
 0x1b4   :  { %v371_v56 = vpop.f32.mrf.mxu0 }
 0x1b5   :  { %v376_v57 = vsel %vm374_vm5, %v369_v52, %v375_v54 }
 0x1b6   :  { %v476_v58 = vpop.f32.mrf.mxu0  ;;  %v384_v59 = vmul.f32 %v428_v55, %v376_v57 }
 0x1b8   :  { %v386_v60 = vsel %vm385_vm6, %v384_v59, 0.0 }
 0x1b9   :  { %387 = vadd.xlane.f32.xlu0 %v386_v60 }
 0x242   :  { %v388_v62 = vpop.xlane.xlu0 %387 }
 0x243   :  { %v396_v63 = vadd.f32 %v429_v61, %v388_v62 }
 0x245   :  { %398 = vst.msk [vmem:[%s655_s9] sm:$0x3] %vm397_vm7, %v396_v63 }

// kernel: calogan_discriminator_forward.8
= control target key start
LH: loop header
LB: loop body
LE: loop exit
PB: predicated region body
PF: predicated region fallthrough
CT: control target
= control target key end

     0   :  { %v163_v35 = vlaneseq  ;;  %v1569_v36 = vmov 1966171168   ;;  %s2055_s1 = inlined_call_operand.vmem [shape: bf16[1152,256], index: 1, kind: input, shape index: {}]   ;;  %s2056_s0 = inlined_call_operand.vmem [shape: bf16[2,1152], index: 0, kind: input, shape index: {}]   ;;  %s2057_s2 = inlined_call_operand.vmem [shape: f32[1,256], index: 2, kind: input, shape index: {}]   ;;  %s2058_s3 = inlined_call_operand.vmem [shape: bf16[2,256], index: 3, kind: output, shape index: {}]  }
   0x1   :  { %v1352_v0 = vld [vmem:[%s2055_s1 + $0x74] ss:$8 sps:$4 sm:$0xff]   ;;  %v1354_v1 = vld [vmem:[%s2055_s1 + $0x70] ss:$8 sps:$4 sm:$0xff]   ;;  %v1358_v4 = vld [vmem:[%s2055_s1 + $0x64] ss:$8 sps:$4 sm:$0xff]   ;;  %v177_v37 = vunpack.c.l.s4 %v1569_v36 }
   0x2   :  { %967 = vmatprep.subr.bf16.mxu0 %v1352_v0  ;;  %v1355_v2 = vld [vmem:[%s2055_s1 + $0x174] ss:$8 sps:$4 sm:$0xff]   ;;  %v1357_v3 = vld [vmem:[%s2055_s1 + $0x170] ss:$8 sps:$4 sm:$0xff]   ;;  %v1360_v5 = vld [vmem:[%s2055_s1 + $0x60] ss:$8 sps:$4 sm:$0xff]  }
   0x3   :  { %968 = vmatpush1.bf16.msra.mxu0 %v1354_v1  ;;  %1008 = vmatprep.subr.bf16.mxu1 %v1355_v2  ;;  %v1361_v6 = vld [vmem:[%s2055_s1 + $0x164] ss:$8 sps:$4 sm:$0xff]   ;;  %v1363_v7 = vld [vmem:[%s2055_s1 + $0x160] ss:$8 sps:$4 sm:$0xff]   ;;  %v1364_v8 = vld [vmem:[%s2055_s1 + $0x54] ss:$8 sps:$4 sm:$0xff]   ;;  %v178_v43 = vunpack.c.0.s8 %v177_v37 }
   0x4   :  { %1009 = vmatpush1.bf16.msra.mxu1 %v1357_v3  ;;  %969 = vmatprep.subr.bf16.mxu0 %v1358_v4  ;;  %v1366_v9 = vld [vmem:[%s2055_s1 + $0x50] ss:$8 sps:$4 sm:$0xff]   ;;  %v1367_v10 = vld [vmem:[%s2055_s1 + $0x154] ss:$8 sps:$4 sm:$0xff]   ;;  %v1370_v11 = vld [vmem:[%s2055_s1 + $0x44] ss:$8 sps:$4 sm:$0xff]  }
   0x5   :  { %1010 = vmatprep.subr.bf16.mxu1 %v1361_v6  ;;  %v1369_v12 = vld [vmem:[%s2055_s1 + $0x150] ss:$8 sps:$4 sm:$0xff]   ;;  %v1373_v13 = vld [vmem:[%s2055_s1 + $0x144] ss:$8 sps:$4 sm:$0xff]   ;;  %v1372_v14 = vld [vmem:[%s2055_s1 + $0x40] ss:$8 sps:$4 sm:$0xff]  }
   0x6   :  { %v1376_v15 = vld [vmem:[%s2055_s1 + $0x34] ss:$8 sps:$4 sm:$0xff]   ;;  %v1375_v16 = vld [vmem:[%s2055_s1 + $0x140] ss:$8 sps:$4 sm:$0xff]   ;;  %v1378_v18 = vld [vmem:[%s2055_s1 + $0x30] ss:$8 sps:$4 sm:$0xff]  }
   0x7   :  { %970 = vmatpush1.bf16.msra.mxu0 %v1360_v5  ;;  %v1379_v17 = vld [vmem:[%s2055_s1 + $0x134] ss:$8 sps:$4 sm:$0xff]   ;;  %v1382_v19 = vld [vmem:[%s2055_s1 + $0x24] ss:$8 sps:$4 sm:$0xff]   ;;  %v1381_v20 = vld [vmem:[%s2055_s1 + $0x130] ss:$8 sps:$4 sm:$0xff]  }
   0x8   :  { %971 = vmatprep.subr.bf16.mxu0 %v1364_v8  ;;  %1011 = vmatpush1.bf16.msra.mxu1 %v1363_v7  ;;  %v1385_v21 = vld [vmem:[%s2055_s1 + $0x124] ss:$8 sps:$4 sm:$0xff]   ;;  %v1384_v22 = vld [vmem:[%s2055_s1 + $0x20] ss:$8 sps:$4 sm:$0xff]   ;;  %v1388_v23 = vld [vmem:[%s2055_s1 + $0x14] ss:$8 sps:$4 sm:$0xff]  }
   0x9   :  { %1012 = vmatprep.subr.bf16.mxu1 %v1367_v10  ;;  %v1387_v24 = vld [vmem:[%s2055_s1 + $0x120] ss:$8 sps:$4 sm:$0xff]   ;;  %v1391_v25 = vld [vmem:[%s2055_s1 + $0x114] ss:$8 sps:$4 sm:$0xff]   ;;  %v1390_v26 = vld [vmem:[%s2055_s1 + $0x10] ss:$8 sps:$4 sm:$0xff]  }
   0xa   :  { %v1394_v27 = vld [vmem:[%s2055_s1 + $0x4] ss:$8 sps:$4 sm:$0xff]   ;;  %v1393_v28 = vld [vmem:[%s2055_s1 + $0x110] ss:$8 sps:$4 sm:$0xff]   ;;  %v1396_v30 = vld [vmem:[%s2055_s1] ss:$8 sps:$4 sm:$0xff]  }
   0xb   :  { %972 = vmatpush1.bf16.msra.mxu0 %v1366_v9  ;;  %v1397_v29 = vld [vmem:[%s2055_s1 + $0x104] ss:$8 sps:$4 sm:$0xff]   ;;  %v1400_v31 = vld [vmem:[%s2055_s1 + $0xf4] ss:$8 sps:$4 sm:$0xff]   ;;  %v1399_v32 = vld [vmem:[%s2055_s1 + $0x100] ss:$8 sps:$4 sm:$0xff]  }
   0xc   :  { %973 = vmatprep.subr.bf16.mxu0 %v1370_v11  ;;  %1013 = vmatpush1.bf16.msra.mxu1 %v1369_v12  ;;  %v1403_v33 = vld [vmem:[%s2055_s1 + $0x1f4] ss:$8 sps:$4 sm:$0xff]   ;;  %v1402_v34 = vld [vmem:[%s2055_s1 + $0xf0] ss:$8 sps:$4 sm:$0xff]   ;;  %v1406_v38 = vld [vmem:[%s2055_s1 + $0xe4] ss:$8 sps:$4 sm:$0xff]  }
   0xd   :  { %1014 = vmatprep.subr.bf16.mxu1 %v1373_v13  ;;  %v1405_v39 = vld [vmem:[%s2055_s1 + $0x1f0] ss:$8 sps:$4 sm:$0xff]   ;;  %v1409_v40 = vld [vmem:[%s2055_s1 + $0x1e4] ss:$8 sps:$4 sm:$0xff]   ;;  %v1408_v41 = vld [vmem:[%s2055_s1 + $0xe0] ss:$8 sps:$4 sm:$0xff]  }
   0xe   :  { %v1708_v42 = vshrl.u32 %v163_v35, 7  ;;  %v1412_v44 = vld [vmem:[%s2055_s1 + $0xd4] ss:$8 sps:$4 sm:$0xff]   ;;  %v1411_v45 = vld [vmem:[%s2055_s1 + $0x1e0] ss:$8 sps:$4 sm:$0xff]  }
   0xf   :  { %974 = vmatpush1.bf16.msra.mxu0 %v1372_v14  ;;  %v1415_v46 = vld [vmem:[%s2055_s1 + $0x1d4] ss:$8 sps:$4 sm:$0xff]   ;;  %v1414_v47 = vld [vmem:[%s2055_s1 + $0xd0] ss:$8 sps:$4 sm:$0xff]   ;;  %v1418_v49 = vld [vmem:[%s2055_s1 + $0xc4] ss:$8 sps:$4 sm:$0xff]  }
  0x10   :  { %975 = vmatprep.subr.bf16.mxu0 %v1376_v15  ;;  %1015 = vmatpush1.bf16.msra.mxu1 %v1375_v16  ;;  %v1723_v48 = vsub.s32 %v178_v43, %v1708_v42  ;;  %v1417_v50 = vld [vmem:[%s2055_s1 + $0x1d0] ss:$8 sps:$4 sm:$0xff]   ;;  %v1421_v51 = vld [vmem:[%s2055_s1 + $0x1c4] ss:$8 sps:$4 sm:$0xff]   ;;  %v1420_v53 = vld [vmem:[%s2055_s1 + $0xc0] ss:$8 sps:$4 sm:$0xff]  }
  0x11   :  { %1016 = vmatprep.subr.bf16.mxu1 %v1379_v17  ;;  %v15_v52 = vld [vmem:[%s2056_s0] sm:$0xff]  ;;  %v1424_v55 = vld [vmem:[%s2055_s1 + $0xb4] ss:$8 sps:$4 sm:$0xff]   ;;  %v1426_v59 = vld [vmem:[%s2055_s1 + $0xb0] ss:$8 sps:$4 sm:$0xff]  }
  0x12   :  { %v182_v54 = vrot.slane %v15_v52, %v1723_v48  ;;  %v1423_v56 = vld [vmem:[%s2055_s1 + $0x1c0] ss:$8 sps:$4 sm:$0xff]   ;;  %v1427_v58 = vld [vmem:[%s2055_s1 + $0x1b4] ss:$8 sps:$4 sm:$0xff]   ;;  %v1430_v61 = vld [vmem:[%s2055_s1 + $0xa4] ss:$8 sps:$4 sm:$0xff]   ;;  %v175_v63 = vcombine.high %v15_v52, %v15_v52 }
  0x13   :  { %976 = vmatpush1.bf16.msra.mxu0 %v1378_v18  ;;  %v1429_v62 = vld [vmem:[%s2055_s1 + $0x1b0] ss:$8 sps:$4 sm:$0xff]   ;;  %v1433_v1 = vld [vmem:[%s2055_s1 + $0x1a4] ss:$8 sps:$4 sm:$0xff]   ;;  %v1432_v2 = vld [vmem:[%s2055_s1 + $0xa0] ss:$8 sps:$4 sm:$0xff]  }
  0x14   :  { %977 = vmatprep.subr.bf16.mxu0 %v1382_v19  ;;  %1017 = vmatpush1.bf16.msra.mxu1 %v1381_v20  ;;  %v190_v57 = vcombine.high %v182_v54, %v182_v54  ;;  %v1436_v3 = vld [vmem:[%s2055_s1 + $0x94] ss:$8 sps:$4 sm:$0xff]   ;;  %v1435_v4 = vld [vmem:[%s2055_s1 + $0x1a0] ss:$8 sps:$4 sm:$0xff]   ;;  %v1773_v5 = vrot.slane %v175_v63, %v1723_v48  ;;  %v1438_v7 = vld [vmem:[%s2055_s1 + $0x90] ss:$8 sps:$4 sm:$0xff]   ;;  %v198_v13 = vrot.slane %v182_v54, %v1723_v48 }
  0x15   :  { %1018 = vmatprep.subr.bf16.mxu1 %v1385_v21  ;;  %v1439_v6 = vld [vmem:[%s2055_s1 + $0x194] ss:$8 sps:$4 sm:$0xff]   ;;  %v1442_v8 = vld [vmem:[%s2055_s1 + $0x84] ss:$8 sps:$4 sm:$0xff]   ;;  %v1441_v9 = vld [vmem:[%s2055_s1 + $0x190] ss:$8 sps:$4 sm:$0xff]  }
  0x16   :  { %v212_v60 = vrot.slane %v190_v57, %v1723_v48  ;;  %v191_v10 = vcombine.high %v1773_v5, %v1773_v5  ;;  %v1445_v11 = vld [vmem:[%s2055_s1 + $0x184] ss:$8 sps:$4 sm:$0xff]   ;;  %v1444_v12 = vld [vmem:[%s2055_s1 + $0x80] ss:$8 sps:$4 sm:$0xff]   ;;  %v1451_v14 = vld [vmem:[%s2055_s1 + $0x274] ss:$8 sps:$4 sm:$0xff]   ;;  %v220_v19 = vcombine.high %v198_v13, %v198_v13 }
  0x17   :  { %978 = vmatpush1.bf16.msra.mxu0 %v1384_v22  ;;  %v1448_v15 = vld [vmem:[%s2055_s1 + $0x180] ss:$8 sps:$4 sm:$0xff]   ;;  %v1454_v17 = vld [vmem:[%s2055_s1 + $0x374] ss:$8 sps:$4 sm:$0xff]   ;;  %v1449_v18 = vld [vmem:[%s2055_s1 + $0x270] ss:$8 sps:$4 sm:$0xff]  }
  0x18   :  { %979 = vmatprep.subr.bf16.mxu0 %v1388_v23  ;;  %1019 = vmatpush1.bf16.msra.mxu1 %v1387_v24  ;;  %v222_v0 = vcombine.high %v212_v60, %v212_v60  ;;  %v219_v16 = vrot.slane %v191_v10, %v1723_v48  ;;  %v1457_v20 = vld [vmem:[%s2055_s1 + $0x264] ss:$8 sps:$4 sm:$0xff]   ;;  %v1452_v21 = vld [vmem:[%s2055_s1 + $0x370] ss:$8 sps:$4 sm:$0xff]   ;;  %v1455_v24 = vld [vmem:[%s2055_s1 + $0x260] ss:$8 sps:$4 sm:$0xff]  }
  0x19   :  { %1020 = vmatprep.subr.bf16.mxu1 %v1391_v25  ;;  %999 = vmatprep.mubr.bf16.mxu0 %v212_v60  ;;  %v1460_v23 = vld [vmem:[%s2055_s1 + $0x364] ss:$8 sps:$4 sm:$0xff]   ;;  %v1463_v25 = vld [vmem:[%s2055_s1 + $0x254] ss:$8 sps:$4 sm:$0xff]   ;;  %v1473_v36 = vld [vmem:[%s2055_s1 + $0x230] ss:$8 sps:$4 sm:$0xff]  }
  0x1a   :  { %1040 = vmatprep.mubr.bf16.mxu1 %v222_v0  ;;  %v223_v22 = vcombine.high %v219_v16, %v219_v16  ;;  %v1478_v35 = vld [vmem:[%s2055_s1 + $0x334] ss:$8 sps:$4 sm:$0xff]   ;;  %v1481_v37 = vld [vmem:[%s2055_s1 + $0x224] ss:$8 sps:$4 sm:$0xff]   ;;  %v1482_v43 = vld [vmem:[%s2055_s1 + $0x320] ss:$8 sps:$4 sm:$0xff]  }
  0x1b   :  { %980 = vmatpush1.bf16.msra.mxu0 %v1390_v26  ;;  %v1458_v26 = vld [vmem:[%s2055_s1 + $0x360] ss:$8 sps:$4 sm:$0xff]   ;;  %v1497_v54 = vld [vmem:[%s2055_s1 + $0x2f0] ss:$8 sps:$4 sm:$0xff]   ;;  %v1508_v57 = vld [vmem:[%s2055_s1 + $0x3e4] ss:$8 sps:$4 sm:$0xff]  }
  0x1c   :  { %981 = vmatprep.subr.bf16.mxu0 %v1394_v27  ;;  %1021 = vmatpush1.bf16.msra.mxu1 %v1393_v28  ;;  %v1466_v27 = vld [vmem:[%s2055_s1 + $0x354] ss:$8 sps:$4 sm:$0xff]   ;;  %v1461_v28 = vld [vmem:[%s2055_s1 + $0x250] ss:$8 sps:$4 sm:$0xff]   ;;  %v1494_v52 = vld [vmem:[%s2055_s1 + $0x300] ss:$8 sps:$4 sm:$0xff]  }
  0x1d   :  { %1022 = vmatprep.subr.bf16.mxu1 %v1397_v29  ;;  %v1469_v29 = vld [vmem:[%s2055_s1 + $0x244] ss:$8 sps:$4 sm:$0xff]   ;;  %v1506_v60 = vld [vmem:[%s2055_s1 + $0x3e0] ss:$8 sps:$4 sm:$0xff]   ;;  %v1512_v0 = vld [vmem:[%s2055_s1 + $0x3d0] ss:$8 sps:$4 sm:$0xff]  }
  0x1e   :  { %v1517_v63 = vld [vmem:[%s2055_s1 + $0x2c4] ss:$8 sps:$4 sm:$0xff]  }
  0x1f   :  { %982 = vmatpush1.bf16.msra.mxu0 %v1396_v30  ;;  %v1464_v30 = vld [vmem:[%s2055_s1 + $0x350] ss:$8 sps:$4 sm:$0xff]   ;;  %v1532_v10 = vld [vmem:[%s2055_s1 + $0x3a4] ss:$8 sps:$4 sm:$0xff]  }
  0x20   :  { %983 = vmatprep.subr.bf16.mxu0 %v1400_v31  ;;  %1023 = vmatpush1.bf16.msra.mxu1 %v1399_v32  ;;  %v1472_v31 = vld [vmem:[%s2055_s1 + $0x344] ss:$8 sps:$4 sm:$0xff]   ;;  %v1467_v32 = vld [vmem:[%s2055_s1 + $0x240] ss:$8 sps:$4 sm:$0xff]  }
  0x21   :  { %1024 = vmatprep.subr.bf16.mxu1 %v1403_v33  ;;  %v1475_v33 = vld [vmem:[%s2055_s1 + $0x234] ss:$8 sps:$4 sm:$0xff]  }
  0x23   :  { %984 = vmatpush2.bf16.msra.mxu0 %v1402_v34  ;;  %v1470_v34 = vld [vmem:[%s2055_s1 + $0x340] ss:$8 sps:$4 sm:$0xff]  }
  0x24   :  { %985 = vmatprep.subr.bf16.mxu0 %v1406_v38  ;;  %1025 = vmatpush2.bf16.msra.mxu1 %v1405_v39  ;;  %v1476_v38 = vld [vmem:[%s2055_s1 + $0x330] ss:$8 sps:$4 sm:$0xff]   ;;  %v1484_v39 = vld [vmem:[%s2055_s1 + $0x324] ss:$8 sps:$4 sm:$0xff]  }
  0x25   :  { %1026 = vmatprep.subr.bf16.mxu1 %v1409_v40  ;;  %v1479_v40 = vld [vmem:[%s2055_s1 + $0x220] ss:$8 sps:$4 sm:$0xff]  }
  0x27   :  { %986 = vmatpush2.bf16.msra.mxu0 %v1408_v41  ;;  %v1487_v41 = vld [vmem:[%s2055_s1 + $0x214] ss:$8 sps:$4 sm:$0xff]  }
  0x28   :  { %987 = vmatprep.subr.bf16.mxu0 %v1412_v44  ;;  %1027 = vmatpush2.bf16.msra.mxu1 %v1411_v45  ;;  %v1490_v44 = vld [vmem:[%s2055_s1 + $0x314] ss:$8 sps:$4 sm:$0xff]   ;;  %v1485_v45 = vld [vmem:[%s2055_s1 + $0x210] ss:$8 sps:$4 sm:$0xff]  }
  0x29   :  { %1028 = vmatprep.subr.bf16.mxu1 %v1415_v46  ;;  %v1493_v46 = vld [vmem:[%s2055_s1 + $0x204] ss:$8 sps:$4 sm:$0xff]  }
  0x2b   :  { %988 = vmatpush2.bf16.msra.mxu0 %v1414_v47  ;;  %v1488_v47 = vld [vmem:[%s2055_s1 + $0x310] ss:$8 sps:$4 sm:$0xff]  }
  0x2c   :  { %989 = vmatprep.subr.bf16.mxu0 %v1418_v49  ;;  %1029 = vmatpush2.bf16.msra.mxu1 %v1417_v50  ;;  %v1496_v49 = vld [vmem:[%s2055_s1 + $0x304] ss:$8 sps:$4 sm:$0xff]   ;;  %v1491_v50 = vld [vmem:[%s2055_s1 + $0x200] ss:$8 sps:$4 sm:$0xff]  }
  0x2d   :  { %1030 = vmatprep.subr.bf16.mxu1 %v1421_v51  ;;  %v1499_v51 = vld [vmem:[%s2055_s1 + $0x2f4] ss:$8 sps:$4 sm:$0xff]  }
  0x2f   :  { %990 = vmatpush2.bf16.msra.mxu0 %v1420_v53  ;;  %v1502_v53 = vld [vmem:[%s2055_s1 + $0x3f4] ss:$8 sps:$4 sm:$0xff]  }
  0x30   :  { %991 = vmatprep.subr.bf16.mxu0 %v1424_v55  ;;  %1031 = vmatpush2.bf16.msra.mxu1 %v1423_v56  ;;  %v1505_v55 = vld [vmem:[%s2055_s1 + $0x2e4] ss:$8 sps:$4 sm:$0xff]   ;;  %v1500_v56 = vld [vmem:[%s2055_s1 + $0x3f0] ss:$8 sps:$4 sm:$0xff]  }
  0x31   :  { %1032 = vmatprep.subr.bf16.mxu1 %v1427_v58  ;;  %v1503_v58 = vld [vmem:[%s2055_s1 + $0x2e0] ss:$8 sps:$4 sm:$0xff]  }
  0x33   :  { %992 = vmatpush2.bf16.msra.mxu0 %v1426_v59  ;;  %v1511_v59 = vld [vmem:[%s2055_s1 + $0x2d4] ss:$8 sps:$4 sm:$0xff]  }
  0x34   :  { %993 = vmatprep.subr.bf16.mxu0 %v1430_v61  ;;  %1033 = vmatpush2.bf16.msra.mxu1 %v1429_v62  ;;  %v1514_v61 = vld [vmem:[%s2055_s1 + $0x3d4] ss:$8 sps:$4 sm:$0xff]   ;;  %v1509_v62 = vld [vmem:[%s2055_s1 + $0x2d0] ss:$8 sps:$4 sm:$0xff]  }
  0x35   :  { %1034 = vmatprep.subr.bf16.mxu1 %v1433_v1  ;;  %v1520_v1 = vld [vmem:[%s2055_s1 + $0x3c4] ss:$8 sps:$4 sm:$0xff]  }
  0x37   :  { %994 = vmatpush2.bf16.msra.mxu0 %v1432_v2  ;;  %v1515_v2 = vld [vmem:[%s2055_s1 + $0x2c0] ss:$8 sps:$4 sm:$0xff]  }
  0x38   :  { %995 = vmatprep.subr.bf16.mxu0 %v1436_v3  ;;  %1035 = vmatpush2.bf16.msra.mxu1 %v1435_v4  ;;  %v1523_v3 = vld [vmem:[%s2055_s1 + $0x2b4] ss:$8 sps:$4 sm:$0xff]   ;;  %v1518_v4 = vld [vmem:[%s2055_s1 + $0x3c0] ss:$8 sps:$4 sm:$0xff]  }
  0x39   :  { %1036 = vmatprep.subr.bf16.mxu1 %v1439_v6  ;;  %v1526_v6 = vld [vmem:[%s2055_s1 + $0x3b4] ss:$8 sps:$4 sm:$0xff]  }
  0x3b   :  { %996 = vmatpush2.bf16.msra.mxu0 %v1438_v7  ;;  %v1521_v7 = vld [vmem:[%s2055_s1 + $0x2b0] ss:$8 sps:$4 sm:$0xff]  }
  0x3c   :  { %997 = vmatprep.subr.bf16.mxu0 %v1442_v8  ;;  %1037 = vmatpush2.bf16.msra.mxu1 %v1441_v9  ;;  %v1529_v8 = vld [vmem:[%s2055_s1 + $0x2a4] ss:$8 sps:$4 sm:$0xff]   ;;  %v1524_v9 = vld [vmem:[%s2055_s1 + $0x3b0] ss:$8 sps:$4 sm:$0xff]  }
  0x3d   :  { %1038 = vmatprep.subr.bf16.mxu1 %v1445_v11  ;;  %v1527_v11 = vld [vmem:[%s2055_s1 + $0x2a0] ss:$8 sps:$4 sm:$0xff]  }
  0x3f   :  { %998 = vmatpush2.bf16.msra.mxu0 %v1444_v12  ;;  %v1535_v12 = vld [vmem:[%s2055_s1 + $0x294] ss:$8 sps:$4 sm:$0xff]  }
  0x40   :  { %1049 = vmatprep.subr.bf16.mxu0 %v1451_v14  ;;  %1039 = vmatpush2.bf16.msra.mxu1 %v1448_v15  ;;  %v1538_v14 = vld [vmem:[%s2055_s1 + $0x394] ss:$8 sps:$4 sm:$0xff]   ;;  %v1533_v15 = vld [vmem:[%s2055_s1 + $0x290] ss:$8 sps:$4 sm:$0xff]  }
  0x41   :  { %1090 = vmatprep.subr.bf16.mxu1 %v1454_v17  ;;  %v1536_v17 = vld [vmem:[%s2055_s1 + $0x390] ss:$8 sps:$4 sm:$0xff]  }
  0x42   :  { %1000 = vmatmul.mubr.bf16.vlgmr.msra.gmra.mxu0 %v198_v13  ;;  %v1530_v13 = vld [vmem:[%s2055_s1 + $0x3a0] ss:$8 sps:$4 sm:$0xff]  }
  0x43   :  { %1050 = vmatpush1.bf16.msra.mxu0 %v1449_v18  ;;  %1081 = vmatprep.mubr.bf16.mxu0 %v219_v16  ;;  %v1541_v16 = vld [vmem:[%s2055_s1 + $0x284] ss:$8 sps:$4 sm:$0xff]  }
  0x44   :  { %1041 = vmatmul.mubr.bf16.vlgmr.msra.gmra.mxu1 %v220_v19  ;;  %1051 = vmatprep.subr.bf16.mxu0 %v1457_v20  ;;  %v1544_v18 = vld [vmem:[%s2055_s1 + $0x384] ss:$8 sps:$4 sm:$0xff]   ;;  %v1539_v19 = vld [vmem:[%s2055_s1 + $0x280] ss:$8 sps:$4 sm:$0xff]   ;;  %v205_v20 = vrot.slane %v1773_v5, %v1723_v48 }
  0x45   :  { %1091 = vmatpush1.bf16.msra.mxu1 %v1452_v21  ;;  %1122 = vmatprep.mubr.bf16.mxu1 %v223_v22  ;;  %v1547_v21 = vld [vmem:[%s2055_s1 + $0x474] ss:$8 sps:$4 sm:$0xff]   ;;  %v1542_v22 = vld [vmem:[%s2055_s1 + $0x380] ss:$8 sps:$4 sm:$0xff]   ;;  %v1550_v5 = vld [vmem:[%s2055_s1 + $0x464] ss:$8 sps:$4 sm:$0xff]  }
  0x46   :  { %1092 = vmatprep.subr.bf16.mxu1 %v1460_v23  ;;  %v1545_v23 = vld [vmem:[%s2055_s1 + $0x470] ss:$8 sps:$4 sm:$0xff]  }
  0x47   :  { %1052 = vmatpush1.bf16.msra.mxu0 %v1455_v24  ;;  %v221_v24 = vcombine.high %v205_v20, %v205_v20 }
  0x48   :  { %1053 = vmatprep.subr.bf16.mxu0 %v1463_v25  ;;  %v1548_v25 = vld [vmem:[%s2055_s1 + $0x460] ss:$8 sps:$4 sm:$0xff]  }
  0x49   :  { %1093 = vmatpush1.bf16.msra.mxu1 %v1458_v26  ;;  %v1570_v26 = vmov 0  }
  0x4a   :  { %1094 = vmatprep.subr.bf16.mxu1 %v1466_v27  ;;  %v1553_v27 = vld [vmem:[%s2055_s1 + $0x454] ss:$8 sps:$4 sm:$0xff]  }
  0x4b   :  { %1054 = vmatpush1.bf16.msra.mxu0 %v1461_v28  ;;  %v1551_v28 = vld [vmem:[%s2055_s1 + $0x450] ss:$8 sps:$4 sm:$0xff]  }
  0x4c   :  { %1055 = vmatprep.subr.bf16.mxu0 %v1469_v29  ;;  %v1556_v29 = vld [vmem:[%s2055_s1 + $0x444] ss:$8 sps:$4 sm:$0xff]  }
  0x4d   :  { %1095 = vmatpush1.bf16.msra.mxu1 %v1464_v30  ;;  %v1554_v30 = vld [vmem:[%s2055_s1 + $0x440] ss:$8 sps:$4 sm:$0xff]  }
  0x4e   :  { %1096 = vmatprep.subr.bf16.mxu1 %v1472_v31  ;;  %v1559_v31 = vld [vmem:[%s2055_s1 + $0x434] ss:$8 sps:$4 sm:$0xff]  }
  0x4f   :  { %1056 = vmatpush1.bf16.msra.mxu0 %v1467_v32  ;;  %v1557_v32 = vld [vmem:[%s2055_s1 + $0x430] ss:$8 sps:$4 sm:$0xff]  }
  0x50   :  { %1057 = vmatprep.subr.bf16.mxu0 %v1475_v33  ;;  %v1562_v33 = vld [vmem:[%s2055_s1 + $0x424] ss:$8 sps:$4 sm:$0xff]  }
  0x51   :  { %1097 = vmatpush1.bf16.msra.mxu1 %v1470_v34  ;;  %v1560_v34 = vld [vmem:[%s2055_s1 + $0x420] ss:$8 sps:$4 sm:$0xff]  }
  0x52   :  { %1098 = vmatprep.subr.bf16.mxu1 %v1478_v35  ;;  %v1565_v35 = vld [vmem:[%s2055_s1 + $0x414] ss:$8 sps:$4 sm:$0xff]  }
  0x53   :  { %1058 = vmatpush1.bf16.msra.mxu0 %v1473_v36  ;;  %v1563_v36 = vld [vmem:[%s2055_s1 + $0x410] ss:$8 sps:$4 sm:$0xff]  }
  0x54   :  { %1059 = vmatprep.subr.bf16.mxu0 %v1481_v37  ;;  %v1568_v37 = vld [vmem:[%s2055_s1 + $0x404] ss:$8 sps:$4 sm:$0xff]  }
  0x55   :  { %1099 = vmatpush1.bf16.msra.mxu1 %v1476_v38  ;;  %v1566_v38 = vld [vmem:[%s2055_s1 + $0x400] ss:$8 sps:$4 sm:$0xff]  }
  0x56   :  { %1100 = vmatprep.subr.bf16.mxu1 %v1484_v39  ;;  %v1203_v39 = vld.sshfl [vmem:[%s2056_s0 + $0x8] sm:$0x1 pattern:$0x75316420] }
  0x57   :  { %1060 = vmatpush1.bf16.msra.mxu0 %v1479_v40  ;;  %v237_v40 = vrot.slane %v1203_v39, %v1723_v48 }
  0x58   :  { %1061 = vmatprep.subr.bf16.mxu0 %v1487_v41  ;;  %v165_v41 = vsub.s32 0, %v1708_v42 }
  0x59   :  { %1101 = vmatpush1.bf16.msra.mxu1 %v1482_v43  ;;  %v161_v43 = vld [vmem:[%s2057_s2] sm:$0x3] }
  0x5a   :  { %1102 = vmatprep.subr.bf16.mxu1 %v1490_v44  ;;  %v169_v44 = vsub.s32 1, %v1708_v42 }
  0x5b   :  { %1062 = vmatpush1.bf16.msra.mxu0 %v1485_v45  ;;  %v166_v45 = vrot.slane %v161_v43, %v165_v41 }
  0x5c   :  { %1063 = vmatprep.subr.bf16.mxu0 %v1493_v46  ;;  %v170_v46 = vrot.slane %v161_v43, %v169_v44 }
  0x5d   :  { %1103 = vmatpush1.bf16.msra.mxu1 %v1488_v47 }
  0x5e   :  { %1104 = vmatprep.subr.bf16.mxu1 %v1496_v49 }
  0x5f   :  { %1064 = vmatpush1.bf16.msra.mxu0 %v1491_v50 }
  0x60   :  { %1065 = vmatprep.subr.bf16.mxu0 %v1499_v51 }
  0x61   :  { %1105 = vmatpush1.bf16.msra.mxu1 %v1494_v52 }
  0x62   :  { %1106 = vmatprep.subr.bf16.mxu1 %v1502_v53 }
  0x63   :  { %1066 = vmatpush2.bf16.msra.mxu0 %v1497_v54 }
  0x64   :  { %1067 = vmatprep.subr.bf16.mxu0 %v1505_v55 }
  0x65   :  { %1107 = vmatpush2.bf16.msra.mxu1 %v1500_v56 }
  0x66   :  { %1108 = vmatprep.subr.bf16.mxu1 %v1508_v57 }
  0x67   :  { %1068 = vmatpush2.bf16.msra.mxu0 %v1503_v58 }
  0x68   :  { %1069 = vmatprep.subr.bf16.mxu0 %v1511_v59 }
  0x69   :  { %1109 = vmatpush2.bf16.msra.mxu1 %v1506_v60 }
  0x6a   :  { %1110 = vmatprep.subr.bf16.mxu1 %v1514_v61 }
  0x6b   :  { %1070 = vmatpush2.bf16.msra.mxu0 %v1509_v62 }
  0x6c   :  { %1071 = vmatprep.subr.bf16.mxu0 %v1517_v63 }
  0x6d   :  { %1111 = vmatpush2.bf16.msra.mxu1 %v1512_v0 }
  0x6e   :  { %1112 = vmatprep.subr.bf16.mxu1 %v1520_v1 }
  0x6f   :  { %1072 = vmatpush2.bf16.msra.mxu0 %v1515_v2 }
  0x70   :  { %1073 = vmatprep.subr.bf16.mxu0 %v1523_v3 }
  0x71   :  { %1113 = vmatpush2.bf16.msra.mxu1 %v1518_v4 }
  0x72   :  { %1114 = vmatprep.subr.bf16.mxu1 %v1526_v6 }
  0x73   :  { %1074 = vmatpush2.bf16.msra.mxu0 %v1521_v7 }
  0x74   :  { %1075 = vmatprep.subr.bf16.mxu0 %v1529_v8 }
  0x75   :  { %1115 = vmatpush2.bf16.msra.mxu1 %v1524_v9 }
  0x76   :  { %1116 = vmatprep.subr.bf16.mxu1 %v1532_v10 }
  0x77   :  { %1076 = vmatpush2.bf16.msra.mxu0 %v1527_v11 }
  0x78   :  { %1077 = vmatprep.subr.bf16.mxu0 %v1535_v12 }
  0x79   :  { %1117 = vmatpush2.bf16.msra.mxu1 %v1530_v13 }
  0x7a   :  { %1118 = vmatprep.subr.bf16.mxu1 %v1538_v14 }
  0x7b   :  { %1078 = vmatpush2.bf16.msra.mxu0 %v1533_v15 }
  0x7c   :  { %1079 = vmatprep.subr.bf16.mxu0 %v1541_v16 }
  0x7d   :  { %1119 = vmatpush2.bf16.msra.mxu1 %v1536_v17 }
  0x7e   :  { %1120 = vmatprep.subr.bf16.mxu1 %v1544_v18 }
  0x7f   :  { %1080 = vmatpush2.bf16.msra.mxu0 %v1539_v19 }
  0x80   :  { %1131 = vmatprep.subr.bf16.mxu0 %v1547_v21 }
  0x81   :  { %1121 = vmatpush2.bf16.msra.mxu1 %v1542_v22 }
  0x82   :  { %1082 = vmatmul.mubr.bf16.vlgmr.msra.gmra.mxu0 %v205_v20 }
  0x83   :  { %1132 = vmatpush1.bf16.msra.mxu0 %v1545_v23  ;;  %1163 = vmatprep.mubr.bf16.mxu0 %v1570_v26 }
  0x84   :  { %1123 = vmatmul.mubr.bf16.vlgmr.msra.gmra.mxu1 %v221_v24  ;;  %1133 = vmatprep.subr.bf16.mxu0 %v1550_v5 }
  0x87   :  { %1134 = vmatpush1.bf16.msra.mxu0 %v1548_v25 }
  0x88   :  { %1135 = vmatprep.subr.bf16.mxu0 %v1553_v27 }
  0x8b   :  { %1136 = vmatpush1.bf16.msra.mxu0 %v1551_v28 }
  0x8c   :  { %1137 = vmatprep.subr.bf16.mxu0 %v1556_v29 }
  0x8f   :  { %1138 = vmatpush1.bf16.msra.mxu0 %v1554_v30 }
  0x90   :  { %1139 = vmatprep.subr.bf16.mxu0 %v1559_v31 }
  0x93   :  { %1140 = vmatpush1.bf16.msra.mxu0 %v1557_v32 }
  0x94   :  { %1141 = vmatprep.subr.bf16.mxu0 %v1562_v33 }
  0x97   :  { %1142 = vmatpush1.bf16.msra.mxu0 %v1560_v34 }
  0x98   :  { %1143 = vmatprep.subr.bf16.mxu0 %v1565_v35 }
  0x9b   :  { %1144 = vmatpush1.bf16.msra.mxu0 %v1563_v36 }
  0x9c   :  { %1145 = vmatprep.subr.bf16.mxu0 %v1568_v37 }
  0x9f   :  { %1146 = vmatpush1.bf16.msra.mxu0 %v1566_v38 }
  0xa2   :  { %1164 = vmatmul.mubr.bf16.vlgmr.msra.gmra.mxu0 %v237_v40 }
 0x102   :  { %v1001_v47 = vpop.f32.mrf.mxu0 }
 0x103   :  { %v1002_v49 = vadd.f32 %v1001_v47, %v166_v45 }
 0x104   :  { %v1003_v50 = vpop.f32.mrf.mxu0  ;;  %v1042_v51 = vpop.f32.mrf.mxu1 }
 0x105   :  { %v1004_v52 = vadd.f32 %v1003_v50, %v170_v46  ;;  %v1043_v53 = vadd.f32 %v1042_v51, %v1002_v49 }
 0x106   :  { %v1005_v54 = vpop.f32.mrf.mxu0  ;;  %v1044_v55 = vpop.f32.mrf.mxu1 }
 0x107   :  { %v1045_v56 = vadd.f32 %v1044_v55, %v1004_v52 }
 0x108   :  { %v1006_v57 = vpop.f32.mrf.mxu0  ;;  %v1046_v58 = vpop.f32.mrf.mxu1 }
 0x10a   :  { %v1047_v59 = vpop.f32.mrf.mxu1 }
 0x142   :  { %v1083_v60 = vpop.f32.mrf.mxu0 }
 0x143   :  { %v1084_v3 = vadd.f32 %v1083_v60, %v1043_v53 }
 0x144   :  { %v1085_v61 = vpop.f32.mrf.mxu0  ;;  %v1124_v62 = vpop.f32.mrf.mxu1 }
 0x145   :  { %v1086_v4 = vadd.f32 %v1085_v61, %v1045_v56  ;;  %v1125_v6 = vadd.f32 %v1124_v62, %v1084_v3 }
 0x146   :  { %v1087_v63 = vpop.f32.mrf.mxu0  ;;  %v1126_v0 = vpop.f32.mrf.mxu1 }
 0x147   :  { %v1127_v8 = vadd.f32 %v1126_v0, %v1086_v4 }
 0x148   :  { %v1088_v42 = vpop.f32.mrf.mxu0  ;;  %v1128_v1 = vpop.f32.mrf.mxu1 }
 0x14a   :  { %v1129_v2 = vpop.f32.mrf.mxu1 }
 0x162   :  { %v1165_v7 = vpop.f32.mrf.mxu0 }
 0x163   :  { %v1166_v9 = vadd.f32 %v1165_v7, %v1125_v6 }
 0x164   :  { %v1167_v10 = vpop.f32.mrf.mxu0 }
 0x165   :  { %v1174_v11 = vmul.f32 0.01, %v1166_v9  ;;  %v1168_v12 = vadd.f32 %v1167_v10, %v1127_v8  ;;  %vm1172_vm0 = vcmp.gt.f32.partialorder %v1166_v9, 0.0 }
 0x166   :  { %v1169_v13 = vpop.f32.mrf.mxu0 }
 0x167   :  { %vm1173_vm1 = vcmp.gt.f32.partialorder %v1168_v12, 0.0  ;;  %v1175_v14 = vmul.f32 0.01, %v1168_v12  ;;  %v1176_v16 = vsel %vm1172_vm0, %v1166_v9, %v1174_v11 }
 0x168   :  { %v1170_v15 = vpop.f32.mrf.mxu0 }
 0x169   :  { %v1177_v17 = vsel %vm1173_vm1, %v1168_v12, %v1175_v14 }
 0x16a   :  { %v1348_v18 = vpack.c.bf16 %v1177_v17, %v1176_v16 }
 0x16c   :  { %v1189_v19 = vrot.slane %v1348_v18, %v1723_v48 }
 0x16e   :  { %1349 = vst.sshfl [vmem:[%s2058_s3] sm:$0x5 pattern:$0x73625140] %v1189_v19 }

</bundles_post_ra>
